<compile_context>
chip_gen: v7x
topology: tpu7x:2x2x1
jax: 0.10.0
libtpu: 0.0.40
codegen_flags: <defaults>
</compile_context>

<pallas_src>
import jax
import jax.numpy as jnp
import numpy as np
from jax.experimental import pallas as pl
from jax.experimental.pallas import tpu as pltpu

# ---- hyperparameters (the reference file leaves them as globals) ----
LINEAR_OUT_DIM = 32
HIDDEN_DIM = 32
OUTPUT_DIM = 16
USE_SIGMOID = True
LN_EPS = 1e-5

B = 2   # batch
T = 8   # sequence length


# =====================================================================
# Packed-parameter slab layout: one f32 [RP, 128] array.
# Every matrix starts at lane 0 and at an 8-aligned row (aligned loads).
# =====================================================================
def _align8(r):
    return (r + 7) & ~7


_r = 0
R_W1 = _r;  _r = _align8(_r + 2)                       # [2, 2L] block-diag layer-1 weight
R_P1 = _r;  _r = _align8(_r + 3)                       # b / gamma / beta   [3, 2L]
R_W2 = _r;  _r = _align8(_r + 2 * LINEAR_OUT_DIM)      # [2L, 2L] block-diag
R_P2 = _r;  _r = _align8(_r + 3)
R_W3 = _r;  _r = _align8(_r + 2 * LINEAR_OUT_DIM)      # [2L, 2L] block-diag
R_P3 = _r;  _r = _align8(_r + 3)
R_WIH = _r; _r = _align8(_r + 2 * LINEAR_OUT_DIM)      # [2L, 3H]  gates r|z|n
R_BIH = _r; _r = _align8(_r + 1)                       # [1, 3H]
R_WHH = _r; _r = _align8(_r + HIDDEN_DIM)              # [H, 3H]
R_BHH = _r; _r = _align8(_r + 1)                       # [1, 3H]
R_WM = _r;  _r = _align8(_r + 3 * HIDDEN_DIM)          # 3 x [H, H]
R_PM = _r;  _r = _align8(_r + 9)                       # 3 x (b, gamma, beta) [9, H]
R_WHD = _r; _r = _align8(_r + HIDDEN_DIM)              # [H, OUT]
R_BHD = _r; _r = _align8(_r + 1)                       # [1, OUT]
RP = _align8(_r)                                       # total rows (424)


# =====================================================================
# Fused kernel
# =====================================================================
def ddsp_kernel(x_ref,   # [T*B, 2]   time-major, col0 = f0, col1 = lo
                p_ref,   # [RP, 128]  packed parameter slab (see layout above)
                o_ref):  # [T*B, OUT] time-major output
    f32 = jnp.float32
    L, H, OUT = LINEAR_OUT_DIM, HIDDEN_DIM, OUTPUT_DIM
    L2, G3 = 2 * L, 3 * H

    def ln_relu(z, g, bt):
        # mean(z) and mean(z*z) are independent -> the two XLU reductions
        # can dual-issue; gamma is folded into the rsqrt scale.
        mu = jnp.mean(z, axis=-1, keepdims=True)
        ms = jnp.mean(z * z, axis=-1, keepdims=True)
        scale = g * jax.lax.rsqrt(ms - mu * mu + LN_EPS)
        return jnp.maximum((z - mu) * scale + bt, 0.0)

    def ln_relu_halves(z, g, bt):
        # LayerNorm over each 32-lane branch half (f0 | lo) independently.
        ha = ln_relu(z[:, 0:L], g[:, 0:L], bt[:, 0:L])
        hb = ln_relu(z[:, L:L2], g[:, L:L2], bt[:, L:L2])
        return jnp.concatenate([ha, hb], axis=-1)

    # ---------- fused branch MLPs (block-diagonal weights, 64 lanes) ----------
    x = x_ref[...]                                                   # [M, 2]
    z = (jnp.dot(x, p_ref[R_W1:R_W1 + 2, 0:L2], preferred_element_type=f32)
         + p_ref[R_P1:R_P1 + 1, 0:L2])
    h = ln_relu_halves(z, p_ref[R_P1 + 1:R_P1 + 2, 0:L2],
                       p_ref[R_P1 + 2:R_P1 + 3, 0:L2])

    for rw, rp in ((R_W2, R_P2), (R_W3, R_P3)):
        z = (jnp.dot(h, p_ref[rw:rw + L2, 0:L2], preferred_element_type=f32)
             + p_ref[rp:rp + 1, 0:L2])
        h = ln_relu_halves(z, p_ref[rp + 1:rp + 2, 0:L2],
                           p_ref[rp + 2:rp + 3, 0:L2])
    # h == [y_f0 | y_lo]  : [M, 2L]

    # ---------- GRU ----------
    # Hoisted input-side gate matmul for ALL T*B rows (gate order r|z|n).
    gx = (jnp.dot(h, p_ref[R_WIH:R_WIH + L2, 0:G3], preferred_element_type=f32)
          + p_ref[R_BIH:R_BIH + 1, 0:G3])                            # [M, 3H]
    whh = p_ref[R_WHH:R_WHH + H, 0:G3]                               # [H, 3H]
    bhh = p_ref[R_BHH:R_BHH + 1, 0:G3]                               # [1, 3H]

    def sig(v):  # logistic via a single EUP tanh (no exact VPU divide)
        return 0.5 * jnp.tanh(0.5 * v) + 0.5

    # TODO(synk): pltpu.matmul_push_rhs/matmul_acc_lhs/matmul_pop could keep
    # W_hh staged in the MXU across the 8-step recurrence (saves 7 restages);
    # skipped to keep lowering portable/robust across v5e/v6e/v7x.
    h_t = jnp.zeros((B, H), f32)
    hs = []
    for t in range(T):                                   # fully unrolled recurrence
        gxt = gx[t * B:(t + 1) * B, :]                   # [B, 3H] (contiguous rows)
        gh = jnp.dot(h_t, whh, preferred_element_type=f32) + bhh
        r = sig(gxt[:, 0:H] + gh[:, 0:H])
        u = sig(gxt[:, H:2 * H] + gh[:, H:2 * H])
        n = jnp.tanh(gxt[:, 2 * H:3 * H] + r * gh[:, 2 * H:3 * H])
        h_t = u * (h_t - n) + n                          # == (1-u)*n + u*h_t
        hs.append(h_t)
    h = jnp.concatenate(hs, axis=0)                      # [M, H], stays in vregs

    # ---------- post-GRU MLP ----------
    for li in range(3):
        rw = R_WM + li * H
        rp = R_PM + 3 * li
        z = (jnp.dot(h, p_ref[rw:rw + H, 0:H], preferred_element_type=f32)
             + p_ref[rp:rp + 1, 0:H])
        h = ln_relu(z, p_ref[rp + 1:rp + 2, 0:H], p_ref[rp + 2:rp + 3, 0:H])

    # ---------- dense head (+ 2*sigmoid^2.3 + 1e-7) ----------
    z = (jnp.dot(h, p_ref[R_WHD:R_WHD + H, 0:OUT], preferred_element_type=f32)
         + p_ref[R_BHD:R_BHD + 1, 0:OUT])
    if USE_SIGMOID:
        log_sig = jnp.minimum(z, 0.0) - jnp.log(1.0 + jnp.exp(-jnp.abs(z)))
        z = 2.0 * jnp.exp(2.3 * log_sig) + 1e-7

    o_ref[...] = z                                       # single time-major store


# =====================================================================
# pallas_call wrapper + forward glue
# =====================================================================
def ddsp_fused_call(xin, pslab):
    vmem = pl.BlockSpec(memory_space=pltpu.MemorySpace.VMEM)
    return pl.pallas_call(
        ddsp_kernel,
        out_shape=jax.ShapeDtypeStruct((T * B, OUTPUT_DIM), jnp.float32),
        in_specs=[vmem, vmem],
        out_specs=vmem,
    )(xin, pslab)


def ddsp_forward(x, pslab):
    # Build time-major rows (row = t*B + b); the output reshape/transpose of
    # 256 floats below is trivial XLA glue.
    xin = jnp.concatenate([x["f0"], x["lo"]], axis=-1)          # [B, T, 2]
    xin = jnp.transpose(xin, (1, 0, 2)).reshape(T * B, 2)       # [T*B, 2]
    out = ddsp_fused_call(xin, pslab)                           # [T*B, OUT]
    return out.reshape(T, B, OUTPUT_DIM).transpose(1, 0, 2)     # [B, T, OUT]


# =====================================================================
# Parameter init (PyTorch-default-style uniform) + packing for the kernel
# =====================================================================
def _init_linear(key, in_dim, out_dim):
    k = 1.0 / np.sqrt(in_dim)
    kw, kb = jax.random.split(key)
    w = jax.random.uniform(kw, (in_dim, out_dim), jnp.float32, -k, k)  # stored (in, out)
    b = jax.random.uniform(kb, (1, out_dim), jnp.float32, -k, k)
    return w, b


def _init_mlp(key, in_dim, out_dim):
    keys = jax.random.split(key, 3)
    dims = [in_dim, out_dim, out_dim]
    p = {}
    for i, (kk, d) in enumerate(zip(keys, dims), start=1):
        w, b = _init_linear(kk, d, out_dim)
        p[f"w{i}"], p[f"b{i}"] = w, b
        p[f"g{i}"] = jnp.ones((1, out_dim), jnp.float32)
        p[f"bt{i}"] = jnp.zeros((1, out_dim), jnp.float32)
    return p


def _init_gru(key, in_dim, hidden):
    k = 1.0 / np.sqrt(hidden)
    names = ["wri", "wzi", "wni", "wrh", "wzh", "wnh",
             "bri", "bzi", "bni", "brh", "bzh", "bnh"]
    shapes = [(in_dim, hidden)] * 3 + [(hidden, hidden)] * 3 + [(1, hidden)] * 6
    keys = jax.random.split(key, len(names))
    return {nm: jax.random.uniform(kk, sh, jnp.float32, -k, k)
            for nm, sh, kk in zip(names, shapes, keys)}


def pack_params(params):
    """Pack every parameter into one lane-dense f32 [RP, 128] slab."""
    pf, plo = params["mlp_f0"], params["mlp_lo"]
    pg, pm, pd = params["gru"], params["mlp"], params["dense"]
    L, H = LINEAR_OUT_DIM, HIDDEN_DIM
    L2 = 2 * L

    slab = np.zeros((RP, 128), np.float32)

    def put(r, a):
        a = np.asarray(a, np.float32)
        if a.ndim == 1:
            a = a[None, :]
        slab[r:r + a.shape[0], :a.shape[1]] = a

    def put_bgt(r, a, b, i):  # biases / gammas / betas for both branches, concat on lanes
        put(r + 0, np.concatenate([np.asarray(a[f"b{i}"]), np.asarray(b[f"b{i}"])], axis=1))
        put(r + 1, np.concatenate([np.asarray(a[f"g{i}"]), np.asarray(b[f"g{i}"])], axis=1))
        put(r + 2, np.concatenate([np.asarray(a[f"bt{i}"]), np.asarray(b[f"bt{i}"])], axis=1))

    def bdiag(a, b):
        m = np.zeros((L2, L2), np.float32)
        m[:L, :L] = np.asarray(a)
        m[L:, L:] = np.asarray(b)
        return m

    # layer-1 block-diagonal weight [2, 2L]
    w1 = np.zeros((2, L2), np.float32)
    w1[0, :L] = np.asarray(pf["w1"]).reshape(-1)
    w1[1, L:] = np.asarray(plo["w1"]).reshape(-1)
    put(R_W1, w1)
    put_bgt(R_P1, pf, plo, 1)

    put(R_W2, bdiag(pf["w2"], plo["w2"]))
    put_bgt(R_P2, pf, plo, 2)
    put(R_W3, bdiag(pf["w3"], plo["w3"]))
    put_bgt(R_P3, pf, plo, 3)

    # GRU (gate order r|z|n)
    put(R_WIH, np.concatenate([pg["wri"], pg["wzi"], pg["wni"]], axis=1))
    put(R_BIH, np.concatenate([pg["bri"], pg["bzi"], pg["bni"]], axis=1))
    put(R_WHH, np.concatenate([pg["wrh"], pg["wzh"], pg["wnh"]], axis=1))
    put(R_BHH, np.concatenate([pg["brh"], pg["bzh"], pg["bnh"]], axis=1))

    # post-GRU MLP
    for i in range(3):
        put(R_WM + i * H, pm[f"w{i + 1}"])
        put(R_PM + 3 * i + 0, pm[f"b{i + 1}"])
        put(R_PM + 3 * i + 1, pm[f"g{i + 1}"])
        put(R_PM + 3 * i + 2, pm[f"bt{i + 1}"])

    # dense head
    put(R_WHD, pd["w"])
    put(R_BHD, pd["b"])
    return jnp.asarray(slab)


# =====================================================================
# Pure-JAX reference (PyTorch semantics) for correctness checking
# =====================================================================
def _mlp_ref(x, p):
    h = x
    for i in (1, 2, 3):
        z = h @ p[f"w{i}"] + p[f"b{i}"]
        mu = jnp.mean(z, -1, keepdims=True)
        var = jnp.mean((z - mu) ** 2, -1, keepdims=True)
        zn = (z - mu) * jax.lax.rsqrt(var + LN_EPS)
        h = jnp.maximum(zn * p[f"g{i}"] + p[f"bt{i}"], 0.0)
    return h


def _gru_ref(y_btd, p):
    def step(h, x):
        r = jax.nn.sigmoid(x @ p["wri"] + p["bri"] + h @ p["wrh"] + p["brh"])
        z = jax.nn.sigmoid(x @ p["wzi"] + p["bzi"] + h @ p["wzh"] + p["bzh"])
        n = jnp.tanh(x @ p["wni"] + p["bni"] + r * (h @ p["wnh"] + p["bnh"]))
        h_new = (1.0 - z) * n + z * h
        return h_new, h_new
    h0 = jnp.zeros((y_btd.shape[0], HIDDEN_DIM), jnp.float32)
    _, ys = jax.lax.scan(step, h0, jnp.swapaxes(y_btd, 0, 1))
    return jnp.swapaxes(ys, 0, 1)                     # [B, T, H]


def _ddsp_ref(x, params):
    y_f0 = _mlp_ref(x["f0"], params["mlp_f0"])        # [B, T, L]
    y_lo = _mlp_ref(x["lo"], params["mlp_lo"])
    y = jnp.concatenate([y_f0, y_lo], axis=2)
    h = _gru_ref(y, params["gru"])
    h = _mlp_ref(h, params["mlp"])
    z = h @ params["dense"]["w"] + params["dense"]["b"]
    if USE_SIGMOID:
        z = 2.0 * jax.nn.sigmoid(z) ** 2.3 + 1e-7
    return z


# =====================================================================
if __name__ == "__main__":
    key = jax.random.PRNGKey(0)
    k_x, k_f0, k_lo, k_gru, k_mlp, k_dense = jax.random.split(key, 6)
    kxf, kxl = jax.random.split(k_x)

    x = {"f0": jax.random.uniform(kxf, (B, T, 1), jnp.float32),
         "lo": jax.random.uniform(kxl, (B, T, 1), jnp.float32)}

    dw, db = _init_linear(k_dense, HIDDEN_DIM, OUTPUT_DIM)
    params = {
        "mlp_f0": _init_mlp(k_f0, 1, LINEAR_OUT_DIM),
        "mlp_lo": _init_mlp(k_lo, 1, LINEAR_OUT_DIM),
        "gru": _init_gru(k_gru, 2 * LINEAR_OUT_DIM, HIDDEN_DIM),
        "mlp": _init_mlp(k_mlp, HIDDEN_DIM, HIDDEN_DIM),
        "dense": {"w": dw, "b": db},
    }
    pslab = pack_params(params)

    fwd = jax.jit(ddsp_forward)
    out = jax.block_until_ready(fwd(x, pslab))

    ref = jax.block_until_ready(_ddsp_ref(x, params))
    assert out.shape == (B, T, OUTPUT_DIM), out.shape
    assert bool(jnp.all(jnp.isfinite(out)))
    np.testing.assert_allclose(np.asarray(out), np.asarray(ref),
                               rtol=1e-3, atol=1e-3)
    print("KERNEL_OK")
</pallas_src>

<mosaic_0001>
module attributes {stable_mosaic.version = 11 : i64} {
  func.func @ddsp_kernel(%arg0: memref<16x2xf32, #tpu.memory_space<vmem>>, %arg1: memref<424x128xf32, #tpu.memory_space<vmem>>, %arg2: memref<16x16xf32, #tpu.memory_space<vmem>>) attributes {dimension_semantics = [], scalar_prefetch = 0 : i64, scratch_operands = 0 : i64, tpu.core_type = #tpu.core_type<tc>} {
    %c0 = arith.constant 0 : index
    %c0_0 = arith.constant 0 : index
    %0 = vector.load %arg0[%c0, %c0_0] : memref<16x2xf32, #tpu.memory_space<vmem>>, vector<16x2xf32>
    %c0_1 = arith.constant 0 : index
    %c0_2 = arith.constant 0 : index
    %1 = vector.load %arg1[%c0_1, %c0_2] : memref<424x128xf32, #tpu.memory_space<vmem>>, vector<2x64xf32>
    %cst = arith.constant dense<0.000000e+00> : vector<16x64xf32>
    %2 = tpu.matmul %0, %1, %cst {dimension_numbers = #tpu.dot_dimension_numbers<[1], [0], [0], [1], [0, 0, 1, 1], [], []>} : vector<16x2xf32>, vector<2x64xf32>, vector<16x64xf32> -> vector<16x64xf32>
    %c8 = arith.constant 8 : index
    %c0_3 = arith.constant 0 : index
    %3 = vector.load %arg1[%c8, %c0_3] : memref<424x128xf32, #tpu.memory_space<vmem>>, vector<1x64xf32>
    %4 = vector.broadcast %3 : vector<1x64xf32> to vector<16x64xf32>
    %5 = arith.addf %2, %4 : vector<16x64xf32>
    %c9 = arith.constant 9 : index
    %c0_4 = arith.constant 0 : index
    %6 = vector.load %arg1[%c9, %c0_4] : memref<424x128xf32, #tpu.memory_space<vmem>>, vector<1x64xf32>
    %c10 = arith.constant 10 : index
    %c0_5 = arith.constant 0 : index
    %7 = vector.load %arg1[%c10, %c0_5] : memref<424x128xf32, #tpu.memory_space<vmem>>, vector<1x64xf32>
    %8 = vector.extract_strided_slice %5 {offsets = [0, 0], sizes = [16, 32], strides = [1, 1]} : vector<16x64xf32> to vector<16x32xf32>
    %9 = vector.extract_strided_slice %6 {offsets = [0, 0], sizes = [1, 32], strides = [1, 1]} : vector<1x64xf32> to vector<1x32xf32>
    %10 = vector.extract_strided_slice %7 {offsets = [0, 0], sizes = [1, 32], strides = [1, 1]} : vector<1x64xf32> to vector<1x32xf32>
    %cst_6 = arith.constant dense<0.000000e+00> : vector<16xf32>
    %11 = vector.multi_reduction <add>, %8, %cst_6 [1] : vector<16x32xf32> to vector<16xf32>
    %12 = vector.shape_cast %11 : vector<16xf32> to vector<16x1xf32>
    %cst_7 = arith.constant 3.200000e+01 : f32
    %13 = vector.broadcast %cst_7 : f32 to vector<16x1xf32>
    %14 = arith.divf %12, %13 : vector<16x1xf32>
    %15 = arith.mulf %8, %8 : vector<16x32xf32>
    %cst_8 = arith.constant dense<0.000000e+00> : vector<16xf32>
    %16 = vector.multi_reduction <add>, %15, %cst_8 [1] : vector<16x32xf32> to vector<16xf32>
    %17 = vector.shape_cast %16 : vector<16xf32> to vector<16x1xf32>
    %cst_9 = arith.constant 3.200000e+01 : f32
    %18 = vector.broadcast %cst_9 : f32 to vector<16x1xf32>
    %19 = arith.divf %17, %18 : vector<16x1xf32>
    %20 = arith.mulf %14, %14 : vector<16x1xf32>
    %21 = arith.subf %19, %20 : vector<16x1xf32>
    %cst_10 = arith.constant 9.99999974E-6 : f32
    %22 = vector.broadcast %cst_10 : f32 to vector<16x1xf32>
    %23 = arith.addf %21, %22 : vector<16x1xf32>
    %24 = math.rsqrt %23 : vector<16x1xf32>
    %25 = vector.broadcast %9 : vector<1x32xf32> to vector<16x32xf32>
    %26 = vector.broadcast %24 : vector<16x1xf32> to vector<16x32xf32>
    %27 = arith.mulf %25, %26 : vector<16x32xf32>
    %28 = vector.broadcast %14 : vector<16x1xf32> to vector<16x32xf32>
    %29 = arith.subf %8, %28 : vector<16x32xf32>
    %30 = arith.mulf %29, %27 : vector<16x32xf32>
    %31 = vector.broadcast %10 : vector<1x32xf32> to vector<16x32xf32>
    %32 = arith.addf %30, %31 : vector<16x32xf32>
    %cst_11 = arith.constant 0.000000e+00 : f32
    %33 = vector.broadcast %cst_11 : f32 to vector<16x32xf32>
    %34 = arith.maximumf %32, %33 : vector<16x32xf32>
    %35 = vector.extract_strided_slice %5 {offsets = [0, 32], sizes = [16, 32], strides = [1, 1]} : vector<16x64xf32> to vector<16x32xf32>
    %36 = vector.extract_strided_slice %6 {offsets = [0, 32], sizes = [1, 32], strides = [1, 1]} : vector<1x64xf32> to vector<1x32xf32>
    %37 = vector.extract_strided_slice %7 {offsets = [0, 32], sizes = [1, 32], strides = [1, 1]} : vector<1x64xf32> to vector<1x32xf32>
    %cst_12 = arith.constant dense<0.000000e+00> : vector<16xf32>
    %38 = vector.multi_reduction <add>, %35, %cst_12 [1] : vector<16x32xf32> to vector<16xf32>
    %39 = vector.shape_cast %38 : vector<16xf32> to vector<16x1xf32>
    %cst_13 = arith.constant 3.200000e+01 : f32
    %40 = vector.broadcast %cst_13 : f32 to vector<16x1xf32>
    %41 = arith.divf %39, %40 : vector<16x1xf32>
    %42 = arith.mulf %35, %35 : vector<16x32xf32>
    %cst_14 = arith.constant dense<0.000000e+00> : vector<16xf32>
    %43 = vector.multi_reduction <add>, %42, %cst_14 [1] : vector<16x32xf32> to vector<16xf32>
    %44 = vector.shape_cast %43 : vector<16xf32> to vector<16x1xf32>
    %cst_15 = arith.constant 3.200000e+01 : f32
    %45 = vector.broadcast %cst_15 : f32 to vector<16x1xf32>
    %46 = arith.divf %44, %45 : vector<16x1xf32>
    %47 = arith.mulf %41, %41 : vector<16x1xf32>
    %48 = arith.subf %46, %47 : vector<16x1xf32>
    %cst_16 = arith.constant 9.99999974E-6 : f32
    %49 = vector.broadcast %cst_16 : f32 to vector<16x1xf32>
    %50 = arith.addf %48, %49 : vector<16x1xf32>
    %51 = math.rsqrt %50 : vector<16x1xf32>
    %52 = vector.broadcast %36 : vector<1x32xf32> to vector<16x32xf32>
    %53 = vector.broadcast %51 : vector<16x1xf32> to vector<16x32xf32>
    %54 = arith.mulf %52, %53 : vector<16x32xf32>
    %55 = vector.broadcast %41 : vector<16x1xf32> to vector<16x32xf32>
    %56 = arith.subf %35, %55 : vector<16x32xf32>
    %57 = arith.mulf %56, %54 : vector<16x32xf32>
    %58 = vector.broadcast %37 : vector<1x32xf32> to vector<16x32xf32>
    %59 = arith.addf %57, %58 : vector<16x32xf32>
    %cst_17 = arith.constant 0.000000e+00 : f32
    %60 = vector.broadcast %cst_17 : f32 to vector<16x32xf32>
    %61 = arith.maximumf %59, %60 : vector<16x32xf32>
    %62 = tpu.concatenate %34, %61 in 1 : vector<16x32xf32>, vector<16x32xf32> -> vector<16x64xf32>
    %c16 = arith.constant 16 : index
    %c0_18 = arith.constant 0 : index
    %63 = vector.load %arg1[%c16, %c0_18] : memref<424x128xf32, #tpu.memory_space<vmem>>, vector<64x64xf32>
    %cst_19 = arith.constant dense<0.000000e+00> : vector<16x64xf32>
    %64 = tpu.matmul %62, %63, %cst_19 {dimension_numbers = #tpu.dot_dimension_numbers<[1], [0], [0], [1], [0, 0, 1, 1], [], []>} : vector<16x64xf32>, vector<64x64xf32>, vector<16x64xf32> -> vector<16x64xf32>
    %c80 = arith.constant 80 : index
    %c0_20 = arith.constant 0 : index
    %65 = vector.load %arg1[%c80, %c0_20] : memref<424x128xf32, #tpu.memory_space<vmem>>, vector<1x64xf32>
    %66 = vector.broadcast %65 : vector<1x64xf32> to vector<16x64xf32>
    %67 = arith.addf %64, %66 : vector<16x64xf32>
    %c81 = arith.constant 81 : index
    %c0_21 = arith.constant 0 : index
    %68 = vector.load %arg1[%c81, %c0_21] : memref<424x128xf32, #tpu.memory_space<vmem>>, vector<1x64xf32>
    %c82 = arith.constant 82 : index
    %c0_22 = arith.constant 0 : index
    %69 = vector.load %arg1[%c82, %c0_22] : memref<424x128xf32, #tpu.memory_space<vmem>>, vector<1x64xf32>
    %70 = vector.extract_strided_slice %67 {offsets = [0, 0], sizes = [16, 32], strides = [1, 1]} : vector<16x64xf32> to vector<16x32xf32>
    %71 = vector.extract_strided_slice %68 {offsets = [0, 0], sizes = [1, 32], strides = [1, 1]} : vector<1x64xf32> to vector<1x32xf32>
    %72 = vector.extract_strided_slice %69 {offsets = [0, 0], sizes = [1, 32], strides = [1, 1]} : vector<1x64xf32> to vector<1x32xf32>
    %cst_23 = arith.constant dense<0.000000e+00> : vector<16xf32>
    %73 = vector.multi_reduction <add>, %70, %cst_23 [1] : vector<16x32xf32> to vector<16xf32>
    %74 = vector.shape_cast %73 : vector<16xf32> to vector<16x1xf32>
    %cst_24 = arith.constant 3.200000e+01 : f32
    %75 = vector.broadcast %cst_24 : f32 to vector<16x1xf32>
    %76 = arith.divf %74, %75 : vector<16x1xf32>
    %77 = arith.mulf %70, %70 : vector<16x32xf32>
    %cst_25 = arith.constant dense<0.000000e+00> : vector<16xf32>
    %78 = vector.multi_reduction <add>, %77, %cst_25 [1] : vector<16x32xf32> to vector<16xf32>
    %79 = vector.shape_cast %78 : vector<16xf32> to vector<16x1xf32>
    %cst_26 = arith.constant 3.200000e+01 : f32
    %80 = vector.broadcast %cst_26 : f32 to vector<16x1xf32>
    %81 = arith.divf %79, %80 : vector<16x1xf32>
    %82 = arith.mulf %76, %76 : vector<16x1xf32>
    %83 = arith.subf %81, %82 : vector<16x1xf32>
    %cst_27 = arith.constant 9.99999974E-6 : f32
    %84 = vector.broadcast %cst_27 : f32 to vector<16x1xf32>
    %85 = arith.addf %83, %84 : vector<16x1xf32>
    %86 = math.rsqrt %85 : vector<16x1xf32>
    %87 = vector.broadcast %71 : vector<1x32xf32> to vector<16x32xf32>
    %88 = vector.broadcast %86 : vector<16x1xf32> to vector<16x32xf32>
    %89 = arith.mulf %87, %88 : vector<16x32xf32>
    %90 = vector.broadcast %76 : vector<16x1xf32> to vector<16x32xf32>
    %91 = arith.subf %70, %90 : vector<16x32xf32>
    %92 = arith.mulf %91, %89 : vector<16x32xf32>
    %93 = vector.broadcast %72 : vector<1x32xf32> to vector<16x32xf32>
    %94 = arith.addf %92, %93 : vector<16x32xf32>
    %cst_28 = arith.constant 0.000000e+00 : f32
    %95 = vector.broadcast %cst_28 : f32 to vector<16x32xf32>
    %96 = arith.maximumf %94, %95 : vector<16x32xf32>
    %97 = vector.extract_strided_slice %67 {offsets = [0, 32], sizes = [16, 32], strides = [1, 1]} : vector<16x64xf32> to vector<16x32xf32>
    %98 = vector.extract_strided_slice %68 {offsets = [0, 32], sizes = [1, 32], strides = [1, 1]} : vector<1x64xf32> to vector<1x32xf32>
    %99 = vector.extract_strided_slice %69 {offsets = [0, 32], sizes = [1, 32], strides = [1, 1]} : vector<1x64xf32> to vector<1x32xf32>
    %cst_29 = arith.constant dense<0.000000e+00> : vector<16xf32>
    %100 = vector.multi_reduction <add>, %97, %cst_29 [1] : vector<16x32xf32> to vector<16xf32>
    %101 = vector.shape_cast %100 : vector<16xf32> to vector<16x1xf32>
    %cst_30 = arith.constant 3.200000e+01 : f32
    %102 = vector.broadcast %cst_30 : f32 to vector<16x1xf32>
    %103 = arith.divf %101, %102 : vector<16x1xf32>
    %104 = arith.mulf %97, %97 : vector<16x32xf32>
    %cst_31 = arith.constant dense<0.000000e+00> : vector<16xf32>
    %105 = vector.multi_reduction <add>, %104, %cst_31 [1] : vector<16x32xf32> to vector<16xf32>
    %106 = vector.shape_cast %105 : vector<16xf32> to vector<16x1xf32>
    %cst_32 = arith.constant 3.200000e+01 : f32
    %107 = vector.broadcast %cst_32 : f32 to vector<16x1xf32>
    %108 = arith.divf %106, %107 : vector<16x1xf32>
    %109 = arith.mulf %103, %103 : vector<16x1xf32>
    %110 = arith.subf %108, %109 : vector<16x1xf32>
    %cst_33 = arith.constant 9.99999974E-6 : f32
    %111 = vector.broadcast %cst_33 : f32 to vector<16x1xf32>
    %112 = arith.addf %110, %111 : vector<16x1xf32>
    %113 = math.rsqrt %112 : vector<16x1xf32>
    %114 = vector.broadcast %98 : vector<1x32xf32> to vector<16x32xf32>
    %115 = vector.broadcast %113 : vector<16x1xf32> to vector<16x32xf32>
    %116 = arith.mulf %114, %115 : vector<16x32xf32>
    %117 = vector.broadcast %103 : vector<16x1xf32> to vector<16x32xf32>
    %118 = arith.subf %97, %117 : vector<16x32xf32>
    %119 = arith.mulf %118, %116 : vector<16x32xf32>
    %120 = vector.broadcast %99 : vector<1x32xf32> to vector<16x32xf32>
    %121 = arith.addf %119, %120 : vector<16x32xf32>
    %cst_34 = arith.constant 0.000000e+00 : f32
    %122 = vector.broadcast %cst_34 : f32 to vector<16x32xf32>
    %123 = arith.maximumf %121, %122 : vector<16x32xf32>
    %124 = tpu.concatenate %96, %123 in 1 : vector<16x32xf32>, vector<16x32xf32> -> vector<16x64xf32>
    %c88 = arith.constant 88 : index
    %c0_35 = arith.constant 0 : index
    %125 = vector.load %arg1[%c88, %c0_35] : memref<424x128xf32, #tpu.memory_space<vmem>>, vector<64x64xf32>
    %cst_36 = arith.constant dense<0.000000e+00> : vector<16x64xf32>
    %126 = tpu.matmul %124, %125, %cst_36 {dimension_numbers = #tpu.dot_dimension_numbers<[1], [0], [0], [1], [0, 0, 1, 1], [], []>} : vector<16x64xf32>, vector<64x64xf32>, vector<16x64xf32> -> vector<16x64xf32>
    %c152 = arith.constant 152 : index
    %c0_37 = arith.constant 0 : index
    %127 = vector.load %arg1[%c152, %c0_37] : memref<424x128xf32, #tpu.memory_space<vmem>>, vector<1x64xf32>
    %128 = vector.broadcast %127 : vector<1x64xf32> to vector<16x64xf32>
    %129 = arith.addf %126, %128 : vector<16x64xf32>
    %c153 = arith.constant 153 : index
    %c0_38 = arith.constant 0 : index
    %130 = vector.load %arg1[%c153, %c0_38] : memref<424x128xf32, #tpu.memory_space<vmem>>, vector<1x64xf32>
    %c154 = arith.constant 154 : index
    %c0_39 = arith.constant 0 : index
    %131 = vector.load %arg1[%c154, %c0_39] : memref<424x128xf32, #tpu.memory_space<vmem>>, vector<1x64xf32>
    %132 = vector.extract_strided_slice %129 {offsets = [0, 0], sizes = [16, 32], strides = [1, 1]} : vector<16x64xf32> to vector<16x32xf32>
    %133 = vector.extract_strided_slice %130 {offsets = [0, 0], sizes = [1, 32], strides = [1, 1]} : vector<1x64xf32> to vector<1x32xf32>
    %134 = vector.extract_strided_slice %131 {offsets = [0, 0], sizes = [1, 32], strides = [1, 1]} : vector<1x64xf32> to vector<1x32xf32>
    %cst_40 = arith.constant dense<0.000000e+00> : vector<16xf32>
    %135 = vector.multi_reduction <add>, %132, %cst_40 [1] : vector<16x32xf32> to vector<16xf32>
    %136 = vector.shape_cast %135 : vector<16xf32> to vector<16x1xf32>
    %cst_41 = arith.constant 3.200000e+01 : f32
    %137 = vector.broadcast %cst_41 : f32 to vector<16x1xf32>
    %138 = arith.divf %136, %137 : vector<16x1xf32>
    %139 = arith.mulf %132, %132 : vector<16x32xf32>
    %cst_42 = arith.constant dense<0.000000e+00> : vector<16xf32>
    %140 = vector.multi_reduction <add>, %139, %cst_42 [1] : vector<16x32xf32> to vector<16xf32>
    %141 = vector.shape_cast %140 : vector<16xf32> to vector<16x1xf32>
    %cst_43 = arith.constant 3.200000e+01 : f32
    %142 = vector.broadcast %cst_43 : f32 to vector<16x1xf32>
    %143 = arith.divf %141, %142 : vector<16x1xf32>
    %144 = arith.mulf %138, %138 : vector<16x1xf32>
    %145 = arith.subf %143, %144 : vector<16x1xf32>
    %cst_44 = arith.constant 9.99999974E-6 : f32
    %146 = vector.broadcast %cst_44 : f32 to vector<16x1xf32>
    %147 = arith.addf %145, %146 : vector<16x1xf32>
    %148 = math.rsqrt %147 : vector<16x1xf32>
    %149 = vector.broadcast %133 : vector<1x32xf32> to vector<16x32xf32>
    %150 = vector.broadcast %148 : vector<16x1xf32> to vector<16x32xf32>
    %151 = arith.mulf %149, %150 : vector<16x32xf32>
    %152 = vector.broadcast %138 : vector<16x1xf32> to vector<16x32xf32>
    %153 = arith.subf %132, %152 : vector<16x32xf32>
    %154 = arith.mulf %153, %151 : vector<16x32xf32>
    %155 = vector.broadcast %134 : vector<1x32xf32> to vector<16x32xf32>
    %156 = arith.addf %154, %155 : vector<16x32xf32>
    %cst_45 = arith.constant 0.000000e+00 : f32
    %157 = vector.broadcast %cst_45 : f32 to vector<16x32xf32>
    %158 = arith.maximumf %156, %157 : vector<16x32xf32>
    %159 = vector.extract_strided_slice %129 {offsets = [0, 32], sizes = [16, 32], strides = [1, 1]} : vector<16x64xf32> to vector<16x32xf32>
    %160 = vector.extract_strided_slice %130 {offsets = [0, 32], sizes = [1, 32], strides = [1, 1]} : vector<1x64xf32> to vector<1x32xf32>
    %161 = vector.extract_strided_slice %131 {offsets = [0, 32], sizes = [1, 32], strides = [1, 1]} : vector<1x64xf32> to vector<1x32xf32>
    %cst_46 = arith.constant dense<0.000000e+00> : vector<16xf32>
    %162 = vector.multi_reduction <add>, %159, %cst_46 [1] : vector<16x32xf32> to vector<16xf32>
    %163 = vector.shape_cast %162 : vector<16xf32> to vector<16x1xf32>
    %cst_47 = arith.constant 3.200000e+01 : f32
    %164 = vector.broadcast %cst_47 : f32 to vector<16x1xf32>
    %165 = arith.divf %163, %164 : vector<16x1xf32>
    %166 = arith.mulf %159, %159 : vector<16x32xf32>
    %cst_48 = arith.constant dense<0.000000e+00> : vector<16xf32>
    %167 = vector.multi_reduction <add>, %166, %cst_48 [1] : vector<16x32xf32> to vector<16xf32>
    %168 = vector.shape_cast %167 : vector<16xf32> to vector<16x1xf32>
    %cst_49 = arith.constant 3.200000e+01 : f32
    %169 = vector.broadcast %cst_49 : f32 to vector<16x1xf32>
    %170 = arith.divf %168, %169 : vector<16x1xf32>
    %171 = arith.mulf %165, %165 : vector<16x1xf32>
    %172 = arith.subf %170, %171 : vector<16x1xf32>
    %cst_50 = arith.constant 9.99999974E-6 : f32
    %173 = vector.broadcast %cst_50 : f32 to vector<16x1xf32>
    %174 = arith.addf %172, %173 : vector<16x1xf32>
    %175 = math.rsqrt %174 : vector<16x1xf32>
    %176 = vector.broadcast %160 : vector<1x32xf32> to vector<16x32xf32>
    %177 = vector.broadcast %175 : vector<16x1xf32> to vector<16x32xf32>
    %178 = arith.mulf %176, %177 : vector<16x32xf32>
    %179 = vector.broadcast %165 : vector<16x1xf32> to vector<16x32xf32>
    %180 = arith.subf %159, %179 : vector<16x32xf32>
    %181 = arith.mulf %180, %178 : vector<16x32xf32>
    %182 = vector.broadcast %161 : vector<1x32xf32> to vector<16x32xf32>
    %183 = arith.addf %181, %182 : vector<16x32xf32>
    %cst_51 = arith.constant 0.000000e+00 : f32
    %184 = vector.broadcast %cst_51 : f32 to vector<16x32xf32>
    %185 = arith.maximumf %183, %184 : vector<16x32xf32>
    %186 = tpu.concatenate %158, %185 in 1 : vector<16x32xf32>, vector<16x32xf32> -> vector<16x64xf32>
    %c160 = arith.constant 160 : index
    %c0_52 = arith.constant 0 : index
    %187 = vector.load %arg1[%c160, %c0_52] : memref<424x128xf32, #tpu.memory_space<vmem>>, vector<64x96xf32>
    %cst_53 = arith.constant dense<0.000000e+00> : vector<16x96xf32>
    %188 = tpu.matmul %186, %187, %cst_53 {dimension_numbers = #tpu.dot_dimension_numbers<[1], [0], [0], [1], [0, 0, 1, 1], [], []>} : vector<16x64xf32>, vector<64x96xf32>, vector<16x96xf32> -> vector<16x96xf32>
    %c224 = arith.constant 224 : index
    %c0_54 = arith.constant 0 : index
    %189 = vector.load %arg1[%c224, %c0_54] : memref<424x128xf32, #tpu.memory_space<vmem>>, vector<1x96xf32>
    %190 = vector.broadcast %189 : vector<1x96xf32> to vector<16x96xf32>
    %191 = arith.addf %188, %190 : vector<16x96xf32>
    %c232 = arith.constant 232 : index
    %c0_55 = arith.constant 0 : index
    %192 = vector.load %arg1[%c232, %c0_55] : memref<424x128xf32, #tpu.memory_space<vmem>>, vector<32x96xf32>
    %c264 = arith.constant 264 : index
    %c0_56 = arith.constant 0 : index
    %193 = vector.load %arg1[%c264, %c0_56] : memref<424x128xf32, #tpu.memory_space<vmem>>, vector<1x96xf32>
    %cst_57 = arith.constant 0.000000e+00 : f32
    %194 = vector.broadcast %cst_57 : f32 to vector<2x32xf32>
    %195 = vector.extract_strided_slice %191 {offsets = [0, 0], sizes = [2, 96], strides = [1, 1]} : vector<16x96xf32> to vector<2x96xf32>
    %cst_58 = arith.constant dense<0.000000e+00> : vector<2x96xf32>
    %196 = tpu.matmul %194, %192, %cst_58 {dimension_numbers = #tpu.dot_dimension_numbers<[1], [0], [0], [1], [0, 0, 1, 1], [], []>} : vector<2x32xf32>, vector<32x96xf32>, vector<2x96xf32> -> vector<2x96xf32>
    %197 = vector.broadcast %193 : vector<1x96xf32> to vector<2x96xf32>
    %198 = arith.addf %196, %197 : vector<2x96xf32>
    %199 = vector.extract_strided_slice %195 {offsets = [0, 0], sizes = [2, 32], strides = [1, 1]} : vector<2x96xf32> to vector<2x32xf32>
    %200 = vector.extract_strided_slice %198 {offsets = [0, 0], sizes = [2, 32], strides = [1, 1]} : vector<2x96xf32> to vector<2x32xf32>
    %201 = arith.addf %199, %200 : vector<2x32xf32>
    %cst_59 = arith.constant 5.000000e-01 : f32
    %202 = vector.broadcast %cst_59 : f32 to vector<2x32xf32>
    %203 = arith.mulf %202, %201 : vector<2x32xf32>
    %204 = math.tanh %203 : vector<2x32xf32>
    %cst_60 = arith.constant 5.000000e-01 : f32
    %205 = vector.broadcast %cst_60 : f32 to vector<2x32xf32>
    %206 = arith.mulf %205, %204 : vector<2x32xf32>
    %cst_61 = arith.constant 5.000000e-01 : f32
    %207 = vector.broadcast %cst_61 : f32 to vector<2x32xf32>
    %208 = arith.addf %206, %207 : vector<2x32xf32>
    %209 = vector.extract_strided_slice %195 {offsets = [0, 32], sizes = [2, 32], strides = [1, 1]} : vector<2x96xf32> to vector<2x32xf32>
    %210 = vector.extract_strided_slice %198 {offsets = [0, 32], sizes = [2, 32], strides = [1, 1]} : vector<2x96xf32> to vector<2x32xf32>
    %211 = arith.addf %209, %210 : vector<2x32xf32>
    %cst_62 = arith.constant 5.000000e-01 : f32
    %212 = vector.broadcast %cst_62 : f32 to vector<2x32xf32>
    %213 = arith.mulf %212, %211 : vector<2x32xf32>
    %214 = math.tanh %213 : vector<2x32xf32>
    %cst_63 = arith.constant 5.000000e-01 : f32
    %215 = vector.broadcast %cst_63 : f32 to vector<2x32xf32>
    %216 = arith.mulf %215, %214 : vector<2x32xf32>
    %cst_64 = arith.constant 5.000000e-01 : f32
    %217 = vector.broadcast %cst_64 : f32 to vector<2x32xf32>
    %218 = arith.addf %216, %217 : vector<2x32xf32>
    %219 = vector.extract_strided_slice %195 {offsets = [0, 64], sizes = [2, 32], strides = [1, 1]} : vector<2x96xf32> to vector<2x32xf32>
    %220 = vector.extract_strided_slice %198 {offsets = [0, 64], sizes = [2, 32], strides = [1, 1]} : vector<2x96xf32> to vector<2x32xf32>
    %221 = arith.mulf %208, %220 : vector<2x32xf32>
    %222 = arith.addf %219, %221 : vector<2x32xf32>
    %223 = math.tanh %222 : vector<2x32xf32>
    %224 = arith.subf %194, %223 : vector<2x32xf32>
    %225 = arith.mulf %218, %224 : vector<2x32xf32>
    %226 = arith.addf %225, %223 : vector<2x32xf32>
    %227 = vector.extract_strided_slice %191 {offsets = [2, 0], sizes = [2, 96], strides = [1, 1]} : vector<16x96xf32> to vector<2x96xf32>
    %cst_65 = arith.constant dense<0.000000e+00> : vector<2x96xf32>
    %228 = tpu.matmul %226, %192, %cst_65 {dimension_numbers = #tpu.dot_dimension_numbers<[1], [0], [0], [1], [0, 0, 1, 1], [], []>} : vector<2x32xf32>, vector<32x96xf32>, vector<2x96xf32> -> vector<2x96xf32>
    %229 = vector.broadcast %193 : vector<1x96xf32> to vector<2x96xf32>
    %230 = arith.addf %228, %229 : vector<2x96xf32>
    %231 = vector.extract_strided_slice %227 {offsets = [0, 0], sizes = [2, 32], strides = [1, 1]} : vector<2x96xf32> to vector<2x32xf32>
    %232 = vector.extract_strided_slice %230 {offsets = [0, 0], sizes = [2, 32], strides = [1, 1]} : vector<2x96xf32> to vector<2x32xf32>
    %233 = arith.addf %231, %232 : vector<2x32xf32>
    %cst_66 = arith.constant 5.000000e-01 : f32
    %234 = vector.broadcast %cst_66 : f32 to vector<2x32xf32>
    %235 = arith.mulf %234, %233 : vector<2x32xf32>
    %236 = math.tanh %235 : vector<2x32xf32>
    %cst_67 = arith.constant 5.000000e-01 : f32
    %237 = vector.broadcast %cst_67 : f32 to vector<2x32xf32>
    %238 = arith.mulf %237, %236 : vector<2x32xf32>
    %cst_68 = arith.constant 5.000000e-01 : f32
    %239 = vector.broadcast %cst_68 : f32 to vector<2x32xf32>
    %240 = arith.addf %238, %239 : vector<2x32xf32>
    %241 = vector.extract_strided_slice %227 {offsets = [0, 32], sizes = [2, 32], strides = [1, 1]} : vector<2x96xf32> to vector<2x32xf32>
    %242 = vector.extract_strided_slice %230 {offsets = [0, 32], sizes = [2, 32], strides = [1, 1]} : vector<2x96xf32> to vector<2x32xf32>
    %243 = arith.addf %241, %242 : vector<2x32xf32>
    %cst_69 = arith.constant 5.000000e-01 : f32
    %244 = vector.broadcast %cst_69 : f32 to vector<2x32xf32>
    %245 = arith.mulf %244, %243 : vector<2x32xf32>
    %246 = math.tanh %245 : vector<2x32xf32>
    %cst_70 = arith.constant 5.000000e-01 : f32
    %247 = vector.broadcast %cst_70 : f32 to vector<2x32xf32>
    %248 = arith.mulf %247, %246 : vector<2x32xf32>
    %cst_71 = arith.constant 5.000000e-01 : f32
    %249 = vector.broadcast %cst_71 : f32 to vector<2x32xf32>
    %250 = arith.addf %248, %249 : vector<2x32xf32>
    %251 = vector.extract_strided_slice %227 {offsets = [0, 64], sizes = [2, 32], strides = [1, 1]} : vector<2x96xf32> to vector<2x32xf32>
    %252 = vector.extract_strided_slice %230 {offsets = [0, 64], sizes = [2, 32], strides = [1, 1]} : vector<2x96xf32> to vector<2x32xf32>
    %253 = arith.mulf %240, %252 : vector<2x32xf32>
    %254 = arith.addf %251, %253 : vector<2x32xf32>
    %255 = math.tanh %254 : vector<2x32xf32>
    %256 = arith.subf %226, %255 : vector<2x32xf32>
    %257 = arith.mulf %250, %256 : vector<2x32xf32>
    %258 = arith.addf %257, %255 : vector<2x32xf32>
    %259 = vector.extract_strided_slice %191 {offsets = [4, 0], sizes = [2, 96], strides = [1, 1]} : vector<16x96xf32> to vector<2x96xf32>
    %cst_72 = arith.constant dense<0.000000e+00> : vector<2x96xf32>
    %260 = tpu.matmul %258, %192, %cst_72 {dimension_numbers = #tpu.dot_dimension_numbers<[1], [0], [0], [1], [0, 0, 1, 1], [], []>} : vector<2x32xf32>, vector<32x96xf32>, vector<2x96xf32> -> vector<2x96xf32>
    %261 = vector.broadcast %193 : vector<1x96xf32> to vector<2x96xf32>
    %262 = arith.addf %260, %261 : vector<2x96xf32>
    %263 = vector.extract_strided_slice %259 {offsets = [0, 0], sizes = [2, 32], strides = [1, 1]} : vector<2x96xf32> to vector<2x32xf32>
    %264 = vector.extract_strided_slice %262 {offsets = [0, 0], sizes = [2, 32], strides = [1, 1]} : vector<2x96xf32> to vector<2x32xf32>
    %265 = arith.addf %263, %264 : vector<2x32xf32>
    %cst_73 = arith.constant 5.000000e-01 : f32
    %266 = vector.broadcast %cst_73 : f32 to vector<2x32xf32>
    %267 = arith.mulf %266, %265 : vector<2x32xf32>
    %268 = math.tanh %267 : vector<2x32xf32>
    %cst_74 = arith.constant 5.000000e-01 : f32
    %269 = vector.broadcast %cst_74 : f32 to vector<2x32xf32>
    %270 = arith.mulf %269, %268 : vector<2x32xf32>
    %cst_75 = arith.constant 5.000000e-01 : f32
    %271 = vector.broadcast %cst_75 : f32 to vector<2x32xf32>
    %272 = arith.addf %270, %271 : vector<2x32xf32>
    %273 = vector.extract_strided_slice %259 {offsets = [0, 32], sizes = [2, 32], strides = [1, 1]} : vector<2x96xf32> to vector<2x32xf32>
    %274 = vector.extract_strided_slice %262 {offsets = [0, 32], sizes = [2, 32], strides = [1, 1]} : vector<2x96xf32> to vector<2x32xf32>
    %275 = arith.addf %273, %274 : vector<2x32xf32>
    %cst_76 = arith.constant 5.000000e-01 : f32
    %276 = vector.broadcast %cst_76 : f32 to vector<2x32xf32>
    %277 = arith.mulf %276, %275 : vector<2x32xf32>
    %278 = math.tanh %277 : vector<2x32xf32>
    %cst_77 = arith.constant 5.000000e-01 : f32
    %279 = vector.broadcast %cst_77 : f32 to vector<2x32xf32>
    %280 = arith.mulf %279, %278 : vector<2x32xf32>
    %cst_78 = arith.constant 5.000000e-01 : f32
    %281 = vector.broadcast %cst_78 : f32 to vector<2x32xf32>
    %282 = arith.addf %280, %281 : vector<2x32xf32>
    %283 = vector.extract_strided_slice %259 {offsets = [0, 64], sizes = [2, 32], strides = [1, 1]} : vector<2x96xf32> to vector<2x32xf32>
    %284 = vector.extract_strided_slice %262 {offsets = [0, 64], sizes = [2, 32], strides = [1, 1]} : vector<2x96xf32> to vector<2x32xf32>
    %285 = arith.mulf %272, %284 : vector<2x32xf32>
    %286 = arith.addf %283, %285 : vector<2x32xf32>
    %287 = math.tanh %286 : vector<2x32xf32>
    %288 = arith.subf %258, %287 : vector<2x32xf32>
    %289 = arith.mulf %282, %288 : vector<2x32xf32>
    %290 = arith.addf %289, %287 : vector<2x32xf32>
    %291 = vector.extract_strided_slice %191 {offsets = [6, 0], sizes = [2, 96], strides = [1, 1]} : vector<16x96xf32> to vector<2x96xf32>
    %cst_79 = arith.constant dense<0.000000e+00> : vector<2x96xf32>
    %292 = tpu.matmul %290, %192, %cst_79 {dimension_numbers = #tpu.dot_dimension_numbers<[1], [0], [0], [1], [0, 0, 1, 1], [], []>} : vector<2x32xf32>, vector<32x96xf32>, vector<2x96xf32> -> vector<2x96xf32>
    %293 = vector.broadcast %193 : vector<1x96xf32> to vector<2x96xf32>
    %294 = arith.addf %292, %293 : vector<2x96xf32>
    %295 = vector.extract_strided_slice %291 {offsets = [0, 0], sizes = [2, 32], strides = [1, 1]} : vector<2x96xf32> to vector<2x32xf32>
    %296 = vector.extract_strided_slice %294 {offsets = [0, 0], sizes = [2, 32], strides = [1, 1]} : vector<2x96xf32> to vector<2x32xf32>
    %297 = arith.addf %295, %296 : vector<2x32xf32>
    %cst_80 = arith.constant 5.000000e-01 : f32
    %298 = vector.broadcast %cst_80 : f32 to vector<2x32xf32>
    %299 = arith.mulf %298, %297 : vector<2x32xf32>
    %300 = math.tanh %299 : vector<2x32xf32>
    %cst_81 = arith.constant 5.000000e-01 : f32
    %301 = vector.broadcast %cst_81 : f32 to vector<2x32xf32>
    %302 = arith.mulf %301, %300 : vector<2x32xf32>
    %cst_82 = arith.constant 5.000000e-01 : f32
    %303 = vector.broadcast %cst_82 : f32 to vector<2x32xf32>
    %304 = arith.addf %302, %303 : vector<2x32xf32>
    %305 = vector.extract_strided_slice %291 {offsets = [0, 32], sizes = [2, 32], strides = [1, 1]} : vector<2x96xf32> to vector<2x32xf32>
    %306 = vector.extract_strided_slice %294 {offsets = [0, 32], sizes = [2, 32], strides = [1, 1]} : vector<2x96xf32> to vector<2x32xf32>
    %307 = arith.addf %305, %306 : vector<2x32xf32>
    %cst_83 = arith.constant 5.000000e-01 : f32
    %308 = vector.broadcast %cst_83 : f32 to vector<2x32xf32>
    %309 = arith.mulf %308, %307 : vector<2x32xf32>
    %310 = math.tanh %309 : vector<2x32xf32>
    %cst_84 = arith.constant 5.000000e-01 : f32
    %311 = vector.broadcast %cst_84 : f32 to vector<2x32xf32>
    %312 = arith.mulf %311, %310 : vector<2x32xf32>
    %cst_85 = arith.constant 5.000000e-01 : f32
    %313 = vector.broadcast %cst_85 : f32 to vector<2x32xf32>
    %314 = arith.addf %312, %313 : vector<2x32xf32>
    %315 = vector.extract_strided_slice %291 {offsets = [0, 64], sizes = [2, 32], strides = [1, 1]} : vector<2x96xf32> to vector<2x32xf32>
    %316 = vector.extract_strided_slice %294 {offsets = [0, 64], sizes = [2, 32], strides = [1, 1]} : vector<2x96xf32> to vector<2x32xf32>
    %317 = arith.mulf %304, %316 : vector<2x32xf32>
    %318 = arith.addf %315, %317 : vector<2x32xf32>
    %319 = math.tanh %318 : vector<2x32xf32>
    %320 = arith.subf %290, %319 : vector<2x32xf32>
    %321 = arith.mulf %314, %320 : vector<2x32xf32>
    %322 = arith.addf %321, %319 : vector<2x32xf32>
    %323 = vector.extract_strided_slice %191 {offsets = [8, 0], sizes = [2, 96], strides = [1, 1]} : vector<16x96xf32> to vector<2x96xf32>
    %cst_86 = arith.constant dense<0.000000e+00> : vector<2x96xf32>
    %324 = tpu.matmul %322, %192, %cst_86 {dimension_numbers = #tpu.dot_dimension_numbers<[1], [0], [0], [1], [0, 0, 1, 1], [], []>} : vector<2x32xf32>, vector<32x96xf32>, vector<2x96xf32> -> vector<2x96xf32>
    %325 = vector.broadcast %193 : vector<1x96xf32> to vector<2x96xf32>
    %326 = arith.addf %324, %325 : vector<2x96xf32>
    %327 = vector.extract_strided_slice %323 {offsets = [0, 0], sizes = [2, 32], strides = [1, 1]} : vector<2x96xf32> to vector<2x32xf32>
    %328 = vector.extract_strided_slice %326 {offsets = [0, 0], sizes = [2, 32], strides = [1, 1]} : vector<2x96xf32> to vector<2x32xf32>
    %329 = arith.addf %327, %328 : vector<2x32xf32>
    %cst_87 = arith.constant 5.000000e-01 : f32
    %330 = vector.broadcast %cst_87 : f32 to vector<2x32xf32>
    %331 = arith.mulf %330, %329 : vector<2x32xf32>
    %332 = math.tanh %331 : vector<2x32xf32>
    %cst_88 = arith.constant 5.000000e-01 : f32
    %333 = vector.broadcast %cst_88 : f32 to vector<2x32xf32>
    %334 = arith.mulf %333, %332 : vector<2x32xf32>
    %cst_89 = arith.constant 5.000000e-01 : f32
    %335 = vector.broadcast %cst_89 : f32 to vector<2x32xf32>
    %336 = arith.addf %334, %335 : vector<2x32xf32>
    %337 = vector.extract_strided_slice %323 {offsets = [0, 32], sizes = [2, 32], strides = [1, 1]} : vector<2x96xf32> to vector<2x32xf32>
    %338 = vector.extract_strided_slice %326 {offsets = [0, 32], sizes = [2, 32], strides = [1, 1]} : vector<2x96xf32> to vector<2x32xf32>
    %339 = arith.addf %337, %338 : vector<2x32xf32>
    %cst_90 = arith.constant 5.000000e-01 : f32
    %340 = vector.broadcast %cst_90 : f32 to vector<2x32xf32>
    %341 = arith.mulf %340, %339 : vector<2x32xf32>
    %342 = math.tanh %341 : vector<2x32xf32>
    %cst_91 = arith.constant 5.000000e-01 : f32
    %343 = vector.broadcast %cst_91 : f32 to vector<2x32xf32>
    %344 = arith.mulf %343, %342 : vector<2x32xf32>
    %cst_92 = arith.constant 5.000000e-01 : f32
    %345 = vector.broadcast %cst_92 : f32 to vector<2x32xf32>
    %346 = arith.addf %344, %345 : vector<2x32xf32>
    %347 = vector.extract_strided_slice %323 {offsets = [0, 64], sizes = [2, 32], strides = [1, 1]} : vector<2x96xf32> to vector<2x32xf32>
    %348 = vector.extract_strided_slice %326 {offsets = [0, 64], sizes = [2, 32], strides = [1, 1]} : vector<2x96xf32> to vector<2x32xf32>
    %349 = arith.mulf %336, %348 : vector<2x32xf32>
    %350 = arith.addf %347, %349 : vector<2x32xf32>
    %351 = math.tanh %350 : vector<2x32xf32>
    %352 = arith.subf %322, %351 : vector<2x32xf32>
    %353 = arith.mulf %346, %352 : vector<2x32xf32>
    %354 = arith.addf %353, %351 : vector<2x32xf32>
    %355 = vector.extract_strided_slice %191 {offsets = [10, 0], sizes = [2, 96], strides = [1, 1]} : vector<16x96xf32> to vector<2x96xf32>
    %cst_93 = arith.constant dense<0.000000e+00> : vector<2x96xf32>
    %356 = tpu.matmul %354, %192, %cst_93 {dimension_numbers = #tpu.dot_dimension_numbers<[1], [0], [0], [1], [0, 0, 1, 1], [], []>} : vector<2x32xf32>, vector<32x96xf32>, vector<2x96xf32> -> vector<2x96xf32>
    %357 = vector.broadcast %193 : vector<1x96xf32> to vector<2x96xf32>
    %358 = arith.addf %356, %357 : vector<2x96xf32>
    %359 = vector.extract_strided_slice %355 {offsets = [0, 0], sizes = [2, 32], strides = [1, 1]} : vector<2x96xf32> to vector<2x32xf32>
    %360 = vector.extract_strided_slice %358 {offsets = [0, 0], sizes = [2, 32], strides = [1, 1]} : vector<2x96xf32> to vector<2x32xf32>
    %361 = arith.addf %359, %360 : vector<2x32xf32>
    %cst_94 = arith.constant 5.000000e-01 : f32
    %362 = vector.broadcast %cst_94 : f32 to vector<2x32xf32>
    %363 = arith.mulf %362, %361 : vector<2x32xf32>
    %364 = math.tanh %363 : vector<2x32xf32>
    %cst_95 = arith.constant 5.000000e-01 : f32
    %365 = vector.broadcast %cst_95 : f32 to vector<2x32xf32>
    %366 = arith.mulf %365, %364 : vector<2x32xf32>
    %cst_96 = arith.constant 5.000000e-01 : f32
    %367 = vector.broadcast %cst_96 : f32 to vector<2x32xf32>
    %368 = arith.addf %366, %367 : vector<2x32xf32>
    %369 = vector.extract_strided_slice %355 {offsets = [0, 32], sizes = [2, 32], strides = [1, 1]} : vector<2x96xf32> to vector<2x32xf32>
    %370 = vector.extract_strided_slice %358 {offsets = [0, 32], sizes = [2, 32], strides = [1, 1]} : vector<2x96xf32> to vector<2x32xf32>
    %371 = arith.addf %369, %370 : vector<2x32xf32>
    %cst_97 = arith.constant 5.000000e-01 : f32
    %372 = vector.broadcast %cst_97 : f32 to vector<2x32xf32>
    %373 = arith.mulf %372, %371 : vector<2x32xf32>
    %374 = math.tanh %373 : vector<2x32xf32>
    %cst_98 = arith.constant 5.000000e-01 : f32
    %375 = vector.broadcast %cst_98 : f32 to vector<2x32xf32>
    %376 = arith.mulf %375, %374 : vector<2x32xf32>
    %cst_99 = arith.constant 5.000000e-01 : f32
    %377 = vector.broadcast %cst_99 : f32 to vector<2x32xf32>
    %378 = arith.addf %376, %377 : vector<2x32xf32>
    %379 = vector.extract_strided_slice %355 {offsets = [0, 64], sizes = [2, 32], strides = [1, 1]} : vector<2x96xf32> to vector<2x32xf32>
    %380 = vector.extract_strided_slice %358 {offsets = [0, 64], sizes = [2, 32], strides = [1, 1]} : vector<2x96xf32> to vector<2x32xf32>
    %381 = arith.mulf %368, %380 : vector<2x32xf32>
    %382 = arith.addf %379, %381 : vector<2x32xf32>
    %383 = math.tanh %382 : vector<2x32xf32>
    %384 = arith.subf %354, %383 : vector<2x32xf32>
    %385 = arith.mulf %378, %384 : vector<2x32xf32>
    %386 = arith.addf %385, %383 : vector<2x32xf32>
    %387 = vector.extract_strided_slice %191 {offsets = [12, 0], sizes = [2, 96], strides = [1, 1]} : vector<16x96xf32> to vector<2x96xf32>
    %cst_100 = arith.constant dense<0.000000e+00> : vector<2x96xf32>
    %388 = tpu.matmul %386, %192, %cst_100 {dimension_numbers = #tpu.dot_dimension_numbers<[1], [0], [0], [1], [0, 0, 1, 1], [], []>} : vector<2x32xf32>, vector<32x96xf32>, vector<2x96xf32> -> vector<2x96xf32>
    %389 = vector.broadcast %193 : vector<1x96xf32> to vector<2x96xf32>
    %390 = arith.addf %388, %389 : vector<2x96xf32>
    %391 = vector.extract_strided_slice %387 {offsets = [0, 0], sizes = [2, 32], strides = [1, 1]} : vector<2x96xf32> to vector<2x32xf32>
    %392 = vector.extract_strided_slice %390 {offsets = [0, 0], sizes = [2, 32], strides = [1, 1]} : vector<2x96xf32> to vector<2x32xf32>
    %393 = arith.addf %391, %392 : vector<2x32xf32>
    %cst_101 = arith.constant 5.000000e-01 : f32
    %394 = vector.broadcast %cst_101 : f32 to vector<2x32xf32>
    %395 = arith.mulf %394, %393 : vector<2x32xf32>
    %396 = math.tanh %395 : vector<2x32xf32>
    %cst_102 = arith.constant 5.000000e-01 : f32
    %397 = vector.broadcast %cst_102 : f32 to vector<2x32xf32>
    %398 = arith.mulf %397, %396 : vector<2x32xf32>
    %cst_103 = arith.constant 5.000000e-01 : f32
    %399 = vector.broadcast %cst_103 : f32 to vector<2x32xf32>
    %400 = arith.addf %398, %399 : vector<2x32xf32>
    %401 = vector.extract_strided_slice %387 {offsets = [0, 32], sizes = [2, 32], strides = [1, 1]} : vector<2x96xf32> to vector<2x32xf32>
    %402 = vector.extract_strided_slice %390 {offsets = [0, 32], sizes = [2, 32], strides = [1, 1]} : vector<2x96xf32> to vector<2x32xf32>
    %403 = arith.addf %401, %402 : vector<2x32xf32>
    %cst_104 = arith.constant 5.000000e-01 : f32
    %404 = vector.broadcast %cst_104 : f32 to vector<2x32xf32>
    %405 = arith.mulf %404, %403 : vector<2x32xf32>
    %406 = math.tanh %405 : vector<2x32xf32>
    %cst_105 = arith.constant 5.000000e-01 : f32
    %407 = vector.broadcast %cst_105 : f32 to vector<2x32xf32>
    %408 = arith.mulf %407, %406 : vector<2x32xf32>
    %cst_106 = arith.constant 5.000000e-01 : f32
    %409 = vector.broadcast %cst_106 : f32 to vector<2x32xf32>
    %410 = arith.addf %408, %409 : vector<2x32xf32>
    %411 = vector.extract_strided_slice %387 {offsets = [0, 64], sizes = [2, 32], strides = [1, 1]} : vector<2x96xf32> to vector<2x32xf32>
    %412 = vector.extract_strided_slice %390 {offsets = [0, 64], sizes = [2, 32], strides = [1, 1]} : vector<2x96xf32> to vector<2x32xf32>
    %413 = arith.mulf %400, %412 : vector<2x32xf32>
    %414 = arith.addf %411, %413 : vector<2x32xf32>
    %415 = math.tanh %414 : vector<2x32xf32>
    %416 = arith.subf %386, %415 : vector<2x32xf32>
    %417 = arith.mulf %410, %416 : vector<2x32xf32>
    %418 = arith.addf %417, %415 : vector<2x32xf32>
    %419 = vector.extract_strided_slice %191 {offsets = [14, 0], sizes = [2, 96], strides = [1, 1]} : vector<16x96xf32> to vector<2x96xf32>
    %cst_107 = arith.constant dense<0.000000e+00> : vector<2x96xf32>
    %420 = tpu.matmul %418, %192, %cst_107 {dimension_numbers = #tpu.dot_dimension_numbers<[1], [0], [0], [1], [0, 0, 1, 1], [], []>} : vector<2x32xf32>, vector<32x96xf32>, vector<2x96xf32> -> vector<2x96xf32>
    %421 = vector.broadcast %193 : vector<1x96xf32> to vector<2x96xf32>
    %422 = arith.addf %420, %421 : vector<2x96xf32>
    %423 = vector.extract_strided_slice %419 {offsets = [0, 0], sizes = [2, 32], strides = [1, 1]} : vector<2x96xf32> to vector<2x32xf32>
    %424 = vector.extract_strided_slice %422 {offsets = [0, 0], sizes = [2, 32], strides = [1, 1]} : vector<2x96xf32> to vector<2x32xf32>
    %425 = arith.addf %423, %424 : vector<2x32xf32>
    %cst_108 = arith.constant 5.000000e-01 : f32
    %426 = vector.broadcast %cst_108 : f32 to vector<2x32xf32>
    %427 = arith.mulf %426, %425 : vector<2x32xf32>
    %428 = math.tanh %427 : vector<2x32xf32>
    %cst_109 = arith.constant 5.000000e-01 : f32
    %429 = vector.broadcast %cst_109 : f32 to vector<2x32xf32>
    %430 = arith.mulf %429, %428 : vector<2x32xf32>
    %cst_110 = arith.constant 5.000000e-01 : f32
    %431 = vector.broadcast %cst_110 : f32 to vector<2x32xf32>
    %432 = arith.addf %430, %431 : vector<2x32xf32>
    %433 = vector.extract_strided_slice %419 {offsets = [0, 32], sizes = [2, 32], strides = [1, 1]} : vector<2x96xf32> to vector<2x32xf32>
    %434 = vector.extract_strided_slice %422 {offsets = [0, 32], sizes = [2, 32], strides = [1, 1]} : vector<2x96xf32> to vector<2x32xf32>
    %435 = arith.addf %433, %434 : vector<2x32xf32>
    %cst_111 = arith.constant 5.000000e-01 : f32
    %436 = vector.broadcast %cst_111 : f32 to vector<2x32xf32>
    %437 = arith.mulf %436, %435 : vector<2x32xf32>
    %438 = math.tanh %437 : vector<2x32xf32>
    %cst_112 = arith.constant 5.000000e-01 : f32
    %439 = vector.broadcast %cst_112 : f32 to vector<2x32xf32>
    %440 = arith.mulf %439, %438 : vector<2x32xf32>
    %cst_113 = arith.constant 5.000000e-01 : f32
    %441 = vector.broadcast %cst_113 : f32 to vector<2x32xf32>
    %442 = arith.addf %440, %441 : vector<2x32xf32>
    %443 = vector.extract_strided_slice %419 {offsets = [0, 64], sizes = [2, 32], strides = [1, 1]} : vector<2x96xf32> to vector<2x32xf32>
    %444 = vector.extract_strided_slice %422 {offsets = [0, 64], sizes = [2, 32], strides = [1, 1]} : vector<2x96xf32> to vector<2x32xf32>
    %445 = arith.mulf %432, %444 : vector<2x32xf32>
    %446 = arith.addf %443, %445 : vector<2x32xf32>
    %447 = math.tanh %446 : vector<2x32xf32>
    %448 = arith.subf %418, %447 : vector<2x32xf32>
    %449 = arith.mulf %442, %448 : vector<2x32xf32>
    %450 = arith.addf %449, %447 : vector<2x32xf32>
    %451 = tpu.concatenate %226, %258, %290, %322, %354, %386, %418, %450 in 0 : vector<2x32xf32>, vector<2x32xf32>, vector<2x32xf32>, vector<2x32xf32>, vector<2x32xf32>, vector<2x32xf32>, vector<2x32xf32>, vector<2x32xf32> -> vector<16x32xf32>
    %c272 = arith.constant 272 : index
    %c0_114 = arith.constant 0 : index
    %452 = vector.load %arg1[%c272, %c0_114] : memref<424x128xf32, #tpu.memory_space<vmem>>, vector<32x32xf32>
    %cst_115 = arith.constant dense<0.000000e+00> : vector<16x32xf32>
    %453 = tpu.matmul %451, %452, %cst_115 {dimension_numbers = #tpu.dot_dimension_numbers<[1], [0], [0], [1], [0, 0, 1, 1], [], []>} : vector<16x32xf32>, vector<32x32xf32>, vector<16x32xf32> -> vector<16x32xf32>
    %c368 = arith.constant 368 : index
    %c0_116 = arith.constant 0 : index
    %454 = vector.load %arg1[%c368, %c0_116] : memref<424x128xf32, #tpu.memory_space<vmem>>, vector<1x32xf32>
    %455 = vector.broadcast %454 : vector<1x32xf32> to vector<16x32xf32>
    %456 = arith.addf %453, %455 : vector<16x32xf32>
    %c369 = arith.constant 369 : index
    %c0_117 = arith.constant 0 : index
    %457 = vector.load %arg1[%c369, %c0_117] : memref<424x128xf32, #tpu.memory_space<vmem>>, vector<1x32xf32>
    %c370 = arith.constant 370 : index
    %c0_118 = arith.constant 0 : index
    %458 = vector.load %arg1[%c370, %c0_118] : memref<424x128xf32, #tpu.memory_space<vmem>>, vector<1x32xf32>
    %cst_119 = arith.constant dense<0.000000e+00> : vector<16xf32>
    %459 = vector.multi_reduction <add>, %456, %cst_119 [1] : vector<16x32xf32> to vector<16xf32>
    %460 = vector.shape_cast %459 : vector<16xf32> to vector<16x1xf32>
    %cst_120 = arith.constant 3.200000e+01 : f32
    %461 = vector.broadcast %cst_120 : f32 to vector<16x1xf32>
    %462 = arith.divf %460, %461 : vector<16x1xf32>
    %463 = arith.mulf %456, %456 : vector<16x32xf32>
    %cst_121 = arith.constant dense<0.000000e+00> : vector<16xf32>
    %464 = vector.multi_reduction <add>, %463, %cst_121 [1] : vector<16x32xf32> to vector<16xf32>
    %465 = vector.shape_cast %464 : vector<16xf32> to vector<16x1xf32>
    %cst_122 = arith.constant 3.200000e+01 : f32
    %466 = vector.broadcast %cst_122 : f32 to vector<16x1xf32>
    %467 = arith.divf %465, %466 : vector<16x1xf32>
    %468 = arith.mulf %462, %462 : vector<16x1xf32>
    %469 = arith.subf %467, %468 : vector<16x1xf32>
    %cst_123 = arith.constant 9.99999974E-6 : f32
    %470 = vector.broadcast %cst_123 : f32 to vector<16x1xf32>
    %471 = arith.addf %469, %470 : vector<16x1xf32>
    %472 = math.rsqrt %471 : vector<16x1xf32>
    %473 = vector.broadcast %457 : vector<1x32xf32> to vector<16x32xf32>
    %474 = vector.broadcast %472 : vector<16x1xf32> to vector<16x32xf32>
    %475 = arith.mulf %473, %474 : vector<16x32xf32>
    %476 = vector.broadcast %462 : vector<16x1xf32> to vector<16x32xf32>
    %477 = arith.subf %456, %476 : vector<16x32xf32>
    %478 = arith.mulf %477, %475 : vector<16x32xf32>
    %479 = vector.broadcast %458 : vector<1x32xf32> to vector<16x32xf32>
    %480 = arith.addf %478, %479 : vector<16x32xf32>
    %cst_124 = arith.constant 0.000000e+00 : f32
    %481 = vector.broadcast %cst_124 : f32 to vector<16x32xf32>
    %482 = arith.maximumf %480, %481 : vector<16x32xf32>
    %c304 = arith.constant 304 : index
    %c0_125 = arith.constant 0 : index
    %483 = vector.load %arg1[%c304, %c0_125] : memref<424x128xf32, #tpu.memory_space<vmem>>, vector<32x32xf32>
    %cst_126 = arith.constant dense<0.000000e+00> : vector<16x32xf32>
    %484 = tpu.matmul %482, %483, %cst_126 {dimension_numbers = #tpu.dot_dimension_numbers<[1], [0], [0], [1], [0, 0, 1, 1], [], []>} : vector<16x32xf32>, vector<32x32xf32>, vector<16x32xf32> -> vector<16x32xf32>
    %c371 = arith.constant 371 : index
    %c0_127 = arith.constant 0 : index
    %485 = vector.load %arg1[%c371, %c0_127] : memref<424x128xf32, #tpu.memory_space<vmem>>, vector<1x32xf32>
    %486 = vector.broadcast %485 : vector<1x32xf32> to vector<16x32xf32>
    %487 = arith.addf %484, %486 : vector<16x32xf32>
    %c372 = arith.constant 372 : index
    %c0_128 = arith.constant 0 : index
    %488 = vector.load %arg1[%c372, %c0_128] : memref<424x128xf32, #tpu.memory_space<vmem>>, vector<1x32xf32>
    %c373 = arith.constant 373 : index
    %c0_129 = arith.constant 0 : index
    %489 = vector.load %arg1[%c373, %c0_129] : memref<424x128xf32, #tpu.memory_space<vmem>>, vector<1x32xf32>
    %cst_130 = arith.constant dense<0.000000e+00> : vector<16xf32>
    %490 = vector.multi_reduction <add>, %487, %cst_130 [1] : vector<16x32xf32> to vector<16xf32>
    %491 = vector.shape_cast %490 : vector<16xf32> to vector<16x1xf32>
    %cst_131 = arith.constant 3.200000e+01 : f32
    %492 = vector.broadcast %cst_131 : f32 to vector<16x1xf32>
    %493 = arith.divf %491, %492 : vector<16x1xf32>
    %494 = arith.mulf %487, %487 : vector<16x32xf32>
    %cst_132 = arith.constant dense<0.000000e+00> : vector<16xf32>
    %495 = vector.multi_reduction <add>, %494, %cst_132 [1] : vector<16x32xf32> to vector<16xf32>
    %496 = vector.shape_cast %495 : vector<16xf32> to vector<16x1xf32>
    %cst_133 = arith.constant 3.200000e+01 : f32
    %497 = vector.broadcast %cst_133 : f32 to vector<16x1xf32>
    %498 = arith.divf %496, %497 : vector<16x1xf32>
    %499 = arith.mulf %493, %493 : vector<16x1xf32>
    %500 = arith.subf %498, %499 : vector<16x1xf32>
    %cst_134 = arith.constant 9.99999974E-6 : f32
    %501 = vector.broadcast %cst_134 : f32 to vector<16x1xf32>
    %502 = arith.addf %500, %501 : vector<16x1xf32>
    %503 = math.rsqrt %502 : vector<16x1xf32>
    %504 = vector.broadcast %488 : vector<1x32xf32> to vector<16x32xf32>
    %505 = vector.broadcast %503 : vector<16x1xf32> to vector<16x32xf32>
    %506 = arith.mulf %504, %505 : vector<16x32xf32>
    %507 = vector.broadcast %493 : vector<16x1xf32> to vector<16x32xf32>
    %508 = arith.subf %487, %507 : vector<16x32xf32>
    %509 = arith.mulf %508, %506 : vector<16x32xf32>
    %510 = vector.broadcast %489 : vector<1x32xf32> to vector<16x32xf32>
    %511 = arith.addf %509, %510 : vector<16x32xf32>
    %cst_135 = arith.constant 0.000000e+00 : f32
    %512 = vector.broadcast %cst_135 : f32 to vector<16x32xf32>
    %513 = arith.maximumf %511, %512 : vector<16x32xf32>
    %c336 = arith.constant 336 : index
    %c0_136 = arith.constant 0 : index
    %514 = vector.load %arg1[%c336, %c0_136] : memref<424x128xf32, #tpu.memory_space<vmem>>, vector<32x32xf32>
    %cst_137 = arith.constant dense<0.000000e+00> : vector<16x32xf32>
    %515 = tpu.matmul %513, %514, %cst_137 {dimension_numbers = #tpu.dot_dimension_numbers<[1], [0], [0], [1], [0, 0, 1, 1], [], []>} : vector<16x32xf32>, vector<32x32xf32>, vector<16x32xf32> -> vector<16x32xf32>
    %c374 = arith.constant 374 : index
    %c0_138 = arith.constant 0 : index
    %516 = vector.load %arg1[%c374, %c0_138] : memref<424x128xf32, #tpu.memory_space<vmem>>, vector<1x32xf32>
    %517 = vector.broadcast %516 : vector<1x32xf32> to vector<16x32xf32>
    %518 = arith.addf %515, %517 : vector<16x32xf32>
    %c375 = arith.constant 375 : index
    %c0_139 = arith.constant 0 : index
    %519 = vector.load %arg1[%c375, %c0_139] : memref<424x128xf32, #tpu.memory_space<vmem>>, vector<1x32xf32>
    %c376 = arith.constant 376 : index
    %c0_140 = arith.constant 0 : index
    %520 = vector.load %arg1[%c376, %c0_140] : memref<424x128xf32, #tpu.memory_space<vmem>>, vector<1x32xf32>
    %cst_141 = arith.constant dense<0.000000e+00> : vector<16xf32>
    %521 = vector.multi_reduction <add>, %518, %cst_141 [1] : vector<16x32xf32> to vector<16xf32>
    %522 = vector.shape_cast %521 : vector<16xf32> to vector<16x1xf32>
    %cst_142 = arith.constant 3.200000e+01 : f32
    %523 = vector.broadcast %cst_142 : f32 to vector<16x1xf32>
    %524 = arith.divf %522, %523 : vector<16x1xf32>
    %525 = arith.mulf %518, %518 : vector<16x32xf32>
    %cst_143 = arith.constant dense<0.000000e+00> : vector<16xf32>
    %526 = vector.multi_reduction <add>, %525, %cst_143 [1] : vector<16x32xf32> to vector<16xf32>
    %527 = vector.shape_cast %526 : vector<16xf32> to vector<16x1xf32>
    %cst_144 = arith.constant 3.200000e+01 : f32
    %528 = vector.broadcast %cst_144 : f32 to vector<16x1xf32>
    %529 = arith.divf %527, %528 : vector<16x1xf32>
    %530 = arith.mulf %524, %524 : vector<16x1xf32>
    %531 = arith.subf %529, %530 : vector<16x1xf32>
    %cst_145 = arith.constant 9.99999974E-6 : f32
    %532 = vector.broadcast %cst_145 : f32 to vector<16x1xf32>
    %533 = arith.addf %531, %532 : vector<16x1xf32>
    %534 = math.rsqrt %533 : vector<16x1xf32>
    %535 = vector.broadcast %519 : vector<1x32xf32> to vector<16x32xf32>
    %536 = vector.broadcast %534 : vector<16x1xf32> to vector<16x32xf32>
    %537 = arith.mulf %535, %536 : vector<16x32xf32>
    %538 = vector.broadcast %524 : vector<16x1xf32> to vector<16x32xf32>
    %539 = arith.subf %518, %538 : vector<16x32xf32>
    %540 = arith.mulf %539, %537 : vector<16x32xf32>
    %541 = vector.broadcast %520 : vector<1x32xf32> to vector<16x32xf32>
    %542 = arith.addf %540, %541 : vector<16x32xf32>
    %cst_146 = arith.constant 0.000000e+00 : f32
    %543 = vector.broadcast %cst_146 : f32 to vector<16x32xf32>
    %544 = arith.maximumf %542, %543 : vector<16x32xf32>
    %c384 = arith.constant 384 : index
    %c0_147 = arith.constant 0 : index
    %545 = vector.load %arg1[%c384, %c0_147] : memref<424x128xf32, #tpu.memory_space<vmem>>, vector<32x16xf32>
    %cst_148 = arith.constant dense<0.000000e+00> : vector<16x16xf32>
    %546 = tpu.matmul %544, %545, %cst_148 {dimension_numbers = #tpu.dot_dimension_numbers<[1], [0], [0], [1], [0, 0, 1, 1], [], []>} : vector<16x32xf32>, vector<32x16xf32>, vector<16x16xf32> -> vector<16x16xf32>
    %c416 = arith.constant 416 : index
    %c0_149 = arith.constant 0 : index
    %547 = vector.load %arg1[%c416, %c0_149] : memref<424x128xf32, #tpu.memory_space<vmem>>, vector<1x16xf32>
    %548 = vector.broadcast %547 : vector<1x16xf32> to vector<16x16xf32>
    %549 = arith.addf %546, %548 : vector<16x16xf32>
    %cst_150 = arith.constant 0.000000e+00 : f32
    %550 = vector.broadcast %cst_150 : f32 to vector<16x16xf32>
    %551 = arith.minimumf %549, %550 : vector<16x16xf32>
    %552 = math.absf %549 : vector<16x16xf32>
    %cst_151 = arith.constant 0.000000e+00 : f32
    %553 = vector.broadcast %cst_151 : f32 to vector<16x16xf32>
    %554 = arith.subf %553, %552 : vector<16x16xf32>
    %555 = math.exp %554 : vector<16x16xf32>
    %cst_152 = arith.constant 1.000000e+00 : f32
    %556 = vector.broadcast %cst_152 : f32 to vector<16x16xf32>
    %557 = arith.addf %556, %555 : vector<16x16xf32>
    %558 = math.log %557 : vector<16x16xf32>
    %559 = arith.subf %551, %558 : vector<16x16xf32>
    %cst_153 = arith.constant 2.300000e+00 : f32
    %560 = vector.broadcast %cst_153 : f32 to vector<16x16xf32>
    %561 = arith.mulf %560, %559 : vector<16x16xf32>
    %562 = math.exp %561 : vector<16x16xf32>
    %cst_154 = arith.constant 2.000000e+00 : f32
    %563 = vector.broadcast %cst_154 : f32 to vector<16x16xf32>
    %564 = arith.mulf %563, %562 : vector<16x16xf32>
    %cst_155 = arith.constant 1.000000e-07 : f32
    %565 = vector.broadcast %cst_155 : f32 to vector<16x16xf32>
    %566 = arith.addf %564, %565 : vector<16x16xf32>
    %c0_156 = arith.constant 0 : index
    %c0_157 = arith.constant 0 : index
    %567 = vector.load %arg2[%c0_156, %c0_157] : memref<16x16xf32, #tpu.memory_space<vmem>>, vector<16x16xf32>
    tpu.vector_store %arg2[%c0_156, %c0_157], %566 {strides = array<i32>} : memref<16x16xf32, #tpu.memory_space<vmem>>, vector<16x16xf32>,
    return
  }
}

</mosaic_0001>

<bundles_post_ra>
// kernel: ddsp_forward.1
= control target key start
LH: loop header
LB: loop body
LE: loop exit
PB: predicated region body
PF: predicated region fallthrough
CT: control target
= control target key end

     0   :  { %7 = vsyncpa [#allocation3], 0  ;;  %s2681_s9 = smov [#allocation2]   ;;  %s3013_s0 = inlined_call_operand.vmem [shape: f32[16,2], index: 0, kind: input, shape index: {}]   ;;  %s3014_s1 = inlined_call_operand.hbm [shape: f32[424,128], index: 1, kind: input, shape index: {}]   ;;  %s3015_s2 = inlined_call_operand.vmem [shape: f32[16,16], index: 2, kind: output, shape index: {}]  }
   0x1   :  { %s15_s10 = sshll.u32 %s2681_s9, 4  ;;  %s2657_s13 = scalar_lea.hbm %s3014_s1, 6784  ;;  %s16_s10 = int_to_ptr.vmem [resolvable:$true] %s15_s10 }
   0x2   :  { %p2658_p0 = scmp.ne.s32.totalorder %s3014_s1, %s2657_s13  ;;  %p2661_p1 = scmp.lt.u32.totalorder %s2657_s13, %s3014_s1 }
   0x4   :  { %p2663_p2 = pnand %p2661_p1, %p2658_p0 }
   0x6   :  { %2666 = shalt.err (!%p2663_p2)
}
   0x7   :  { %s2667_s18 = scalar_lea.vmem %s16_s10, 6784  ;;  %p2672_p4 = scmp.lt.s32.totalorder %s16_s10, %s16_s10 }
   0x8   :  { %p2668_p3 = scmp.ne.s32.totalorder %s16_s10, %s2667_s18  ;;  %p2673_p5 = scmp.lt.s32.totalorder %s2667_s18, %s2667_s18 }
   0xa   :  { %p2674_p6 = por %p2673_p5, %p2672_p4 }
   0xc   :  { %p2675_p7 = pnand %p2674_p6, %p2668_p3 }
   0xe   :  { %2678 = shalt.err (!%p2675_p7)
}
   0xf   :  { %s2682_s19 = smov 128   ;;  %s2683_s20 = smov 8  }
  0x10   :  { %21 = dma.hbm_to_vmem [thread:$0]  %s3014_s1, 6784, %s16_s10, [#allocation3], %s2682_s19, %s2682_s19, %s2683_s20  }
  0x11   :  { %2679 = dma.done.wait [#allocation3], 6784  }
  0x12   :  { %2680 = vsyncadd [#allocation3], 4294960512  ;;  %vm40_vm0 = vcmask 1041408   ;;  %vm33_vm1 = vcmask 15360   ;;  %v27_v0 = vld [vmem:[#allocation2] sm:$0x3] }
  0x13   :  { %v25_v1 = vld [vmem:[%s3013_s0] sm:$0xff]  ;;  %v26_v2 = vld [vmem:[%s3013_s0 + $0x8] sm:$0xff]  ;;  %2247 = vmatprep.subr.msk.mxu0 %vm40_vm0, %v27_v0  ;;  %s2684_s1 = smov 96   ;;  %vm121_vm2 = vcmask 261120   ;;  %v219_v22 = vld [vmem:[#allocation2 + $0x10] sm:$0xff]  ;;  %vm232_vm3 = vcmask 523264  }
  0x14   :  { %2249 = vmatprep.mubr.msk.f32.mxu0 %vm33_vm1, %v25_v1  ;;  %2248 = vmatpush3.msk.msra.mxu0 %vm40_vm0, %v27_v0  ;;  %v2105_v3 = vld [vmem:[#allocation2 + $0x8] ss:$0 sm:$0xff]  ;;  %v220_v23 = vld [vmem:[#allocation2 + $0x18] sm:$0xff]  ;;  %v221_v24 = vld [vmem:[#allocation2 + $0x20] sm:$0xff]  ;;  %vm2686_vm4 = vmmov 0   ;;  %s2688_s0 = smov 64  }
  0x15   :  { %2250 = vmatmul.mubr.msk.f32.vlgmr.msra.gmra.mrb[0].mxu0 %vm33_vm1, %v26_v2  ;;  %v2441_v25 = vpack.c.bf16 %v220_v23, %v219_v22  ;;  %v222_v26 = vld [vmem:[#allocation2 + $0x28] sm:$0xff]  ;;  %v223_v28 = vld [vmem:[#allocation2 + $0x30] sm:$0xff]  ;;  %v224_v29 = vld [vmem:[#allocation2 + $0x38] sm:$0xff]  ;;  %vm1560_vm5 = vcmask 1043456   ;;  %vm1562_vm6 = vcmask 1045504   ;;  %vm2097_vm7 = vcmask 130048  }
  0x16   :  { %v2445_v27 = vpack.c.bf16 %v222_v26, %v221_v24  ;;  %v2449_v30 = vpack.c.bf16 %v224_v29, %v223_v28  ;;  %v225_v31 = vld [vmem:[#allocation2 + $0x40] sm:$0xff]  ;;  %v226_v32 = vld [vmem:[#allocation2 + $0x48] sm:$0xff] }
  0x17   :  { %2442 = vmatprep.subr.bf16.mxu1 %v2441_v25  ;;  %v2453_v33 = vpack.c.bf16 %v226_v32, %v225_v31  ;;  %v2109_v63 = vld [vmem:[#allocation2 + $0x9] ss:$0 sm:$0xff] }
  0x18   :  { %2444 = vmatpush3.bf16.msra.mxu1 %v2441_v25 }
  0x19   :  { %2446 = vmatprep.subr.bf16.mxu1 %v2445_v27 }
  0x1c   :  { %2448 = vmatpush3.bf16.msra.mxu1 %v2445_v27  ;;  %v2111_v27 = vld [vmem:[#allocation2 + $0x50] ss:$0 sm:$0xff] }
  0x1d   :  { %2450 = vmatprep.subr.bf16.mxu1 %v2449_v30 }
  0x20   :  { %2452 = vmatpush3.bf16.msra.mxu1 %v2449_v30 }
  0x21   :  { %2454 = vmatprep.subr.bf16.mxu1 %v2453_v33 }
  0x24   :  { %2456 = vmatpush3.bf16.msra.mxu1 %v2453_v33 }
  0xe8   :  { %v2251_v4 = vpop.f32.mrb[0].mxu0 }
  0xe9   :  { %v110_v5 = vpop.f32.mrb[1].mxu0  ;;  %v2726_v7 = vadd.f32 %v2251_v4, %v2105_v3 }
  0xea   :  { %v2724_v6 = vadd.f32 %v2105_v3, %v110_v5 }
  0xeb   :  { %v132_v9 = vmul.f32 %v2726_v7, %v2726_v7  ;;  %v125_v11 = vsel %vm121_vm2, %v2726_v7, 0.0 }
  0xec   :  { %169 = vrot.lane.b32.xlu0 %v2724_v6, %s2684_s1  ;;  %v131_v8 = vmul.f32 %v2724_v6, %v2724_v6  ;;  %v122_v10 = vsel %vm121_vm2, %v2724_v6, 0.0 }
  0xed   :  { %v136_v17 = vsel %vm121_vm2, %v132_v9, 0.0 }
  0xee   :  { %185 = vrot.lane.b32.xlu1 %v131_v8, %s2684_s1  ;;  %v133_v12 = vsel %vm121_vm2, %v131_v8, 0.0  ;;  %v2110_v8 = vld [vmem:[#allocation2 + $0xa] ss:$0 sm:$0xff] }
  0xf0   :  { %171 = vrot.lane.b32.xlu0 %v2726_v7, %s2684_s1 }
  0xf2   :  { %187 = vrot.lane.b32.xlu1 %v132_v9, %s2684_s1 }
 0x10f   :  { %123 = vadd.xlane.f32.xlu0 %v122_v10 }
 0x113   :  { %126 = vadd.xlane.f32.xlu0 %v125_v11 }
 0x116   :  { %134 = vadd.xlane.f32.xlu1 %v133_v12 }
 0x15e   :  { %v170_v13 = vpop.permute.xlu0 %169 }
 0x15f   :  { %v175_v14 = vsel %vm121_vm2, %v170_v13, 0.0 }
 0x160   :  { %176 = vadd.xlane.f32.xlu1 %v175_v14  ;;  %v186_v15 = vpop.permute.xlu1 %185 }
 0x161   :  { %v191_v19 = vsel %vm121_vm2, %v186_v15, 0.0 }
 0x162   :  { %v172_v16 = vpop.permute.xlu0 %171 }
 0x163   :  { %v178_v18 = vsel %vm121_vm2, %v172_v16, 0.0 }
 0x164   :  { %137 = vadd.xlane.f32.xlu1 %v136_v17  ;;  %179 = vadd.xlane.f32.xlu0 %v178_v18  ;;  %v188_v20 = vpop.permute.xlu1 %187 }
 0x165   :  { %v194_v21 = vsel %vm121_vm2, %v188_v20, 0.0 }
 0x168   :  { %192 = vadd.xlane.f32.xlu0 %v191_v19 }
 0x16c   :  { %195 = vadd.xlane.f32.xlu0 %v194_v21 }
 0x19c   :  { %v124_v34 = vpop.xlane.xlu0 %123 }
 0x19d   :  { %v129_v36 = vmul.f32 0.03125, %v124_v34 }
 0x19f   :  { %v141_v38 = vmul.f32 %v129_v36, %v129_v36  ;;  %v155_v2 = vsub.f32 %v2724_v6, %v129_v36 }
 0x1a0   :  { %v127_v39 = vpop.xlane.xlu0 %126 }
 0x1a1   :  { %v130_v42 = vmul.f32 0.03125, %v127_v39 }
 0x1a3   :  { %v135_v35 = vpop.xlane.xlu1 %134  ;;  %v142_v46 = vmul.f32 %v130_v42, %v130_v42  ;;  %v156_v9 = vsub.f32 %v2726_v7, %v130_v42 }
 0x1a4   :  { %v139_v37 = vmul.f32 0.03125, %v135_v35 }
 0x1a6   :  { %v143_v40 = vsub.f32 %v139_v37, %v141_v38 }
 0x1a8   :  { %v145_v43 = vadd.f32 1e-05, %v143_v40 }
 0x1aa   :  { %2577 = vrsqrt.f32 %v145_v43 }
 0x1b4   :  { %v2578_v61 = vpop.eup %2577 }
 0x1b5   :  { %v153_v0 = vmul.f32 %v2578_v61, %v2109_v63 }
 0x1b7   :  { %v157_v3 = vmul.f32 %v155_v2, %v153_v0 }
 0x1b9   :  { %v163_v12 = vadd.f32 %v2110_v8, %v157_v3 }
 0x1bb   :  { %v165_v19 = vmax.f32 %v163_v12, 0.0 }
 0x1ed   :  { %v177_v41 = vpop.xlane.xlu1 %176 }
 0x1ee   :  { %v181_v47 = vmul.f32 0.03125, %v177_v41 }
 0x1f0   :  { %v199_v51 = vmul.f32 %v181_v47, %v181_v47  ;;  %v209_v10 = vsub.f32 %v2724_v6, %v181_v47 }
 0x1f1   :  { %v138_v44 = vpop.xlane.xlu1 %137  ;;  %v180_v45 = vpop.xlane.xlu0 %179 }
 0x1f2   :  { %v140_v48 = vmul.f32 0.03125, %v138_v44  ;;  %v182_v53 = vmul.f32 0.03125, %v180_v45  ;;  %v412_v45 = vld [vmem:[#allocation2 + $0x58] sm:$0xff] }
 0x1f4   :  { %v144_v49 = vsub.f32 %v140_v48, %v142_v46  ;;  %v200_v57 = vmul.f32 %v182_v53, %v182_v53  ;;  %v210_v16 = vsub.f32 %v2726_v7, %v182_v53  ;;  %v413_v46 = vld [vmem:[#allocation2 + $0x60] sm:$0xff]  ;;  %v414_v48 = vld [vmem:[#allocation2 + $0x68] sm:$0xff] }
 0x1f5   :  { %v193_v50 = vpop.xlane.xlu0 %192  ;;  %v2457_v47 = vpack.c.bf16 %v413_v46, %v412_v45 }
 0x1f6   :  { %v146_v52 = vadd.f32 1e-05, %v144_v49  ;;  %v197_v54 = vmul.f32 0.03125, %v193_v50  ;;  %v415_v49 = vld [vmem:[#allocation2 + $0x70] sm:$0xff] }
 0x1f7   :  { %2458 = vmatprep.subr.bf16.mxu0 %v2457_v47  ;;  %v2461_v50 = vpack.c.bf16 %v415_v49, %v414_v48 }
 0x1f8   :  { %2579 = vrsqrt.f32 %v146_v52  ;;  %v201_v55 = vsub.f32 %v197_v54, %v199_v51  ;;  %2460 = vmatpush3.bf16.msra.mxu0 %v2457_v47  ;;  %v416_v51 = vld [vmem:[#allocation2 + $0x78] sm:$0xff]  ;;  %v417_v52 = vld [vmem:[#allocation2 + $0x80] sm:$0xff]  ;;  %v418_v54 = vld [vmem:[#allocation2 + $0x88] sm:$0xff] }
 0x1f9   :  { %v196_v56 = vpop.xlane.xlu0 %195  ;;  %2462 = vmatprep.subr.bf16.mxu0 %v2461_v50  ;;  %v2465_v53 = vpack.c.bf16 %v417_v52, %v416_v51 }
 0x1fa   :  { %v203_v58 = vadd.f32 1e-05, %v201_v55  ;;  %v198_v59 = vmul.f32 0.03125, %v196_v56  ;;  %v419_v55 = vld [vmem:[#allocation2 + $0x90] sm:$0xff] }
 0x1fb   :  { %v2469_v56 = vpack.c.bf16 %v419_v55, %v418_v54 }
 0x1fc   :  { %2581 = vrsqrt.f32 %v203_v58  ;;  %v202_v60 = vsub.f32 %v198_v59, %v200_v57  ;;  %2464 = vmatpush3.bf16.msra.mxu0 %v2461_v50  ;;  %v2116_v50 = vld [vmem:[#allocation2 + $0x98] ss:$0 sm:$0xff] }
 0x1fd   :  { %2466 = vmatprep.subr.bf16.mxu0 %v2465_v53 }
 0x1fe   :  { %v204_v62 = vadd.f32 1e-05, %v202_v60 }
 0x200   :  { %2583 = vrsqrt.f32 %v204_v62  ;;  %2468 = vmatpush3.bf16.msra.mxu0 %v2465_v53 }
 0x201   :  { %2470 = vmatprep.subr.bf16.mxu0 %v2469_v56 }
 0x202   :  { %v2580_v1 = vpop.eup %2579 }
 0x203   :  { %v154_v4 = vmul.f32 %v2580_v1, %v2109_v63 }
 0x204   :  { %2472 = vmatpush3.bf16.msra.mxu0 %v2469_v56 }
 0x205   :  { %v158_v14 = vmul.f32 %v156_v9, %v154_v4 }
 0x206   :  { %v2582_v5 = vpop.eup %2581 }
 0x207   :  { %v207_v11 = vmul.f32 %v2582_v5, %v2109_v63  ;;  %v164_v21 = vadd.f32 %v2110_v8, %v158_v14 }
 0x209   :  { %v211_v13 = vmul.f32 %v209_v10, %v207_v11  ;;  %v166_v6 = vmax.f32 %v164_v21, 0.0 }
 0x20a   :  { %v2584_v15 = vpop.eup %2583 }
 0x20b   :  { %v213_v17 = vadd.f32 %v2110_v8, %v211_v13  ;;  %v208_v18 = vmul.f32 %v2584_v15, %v2109_v63 }
 0x20d   :  { %v215_v20 = vmax.f32 %v213_v17, 0.0  ;;  %v212_v22 = vmul.f32 %v210_v16, %v208_v18 }
 0x20f   :  { %v217_v23 = vsel %vm121_vm2, %v165_v19, %v215_v20  ;;  %v214_v24 = vadd.f32 %v2110_v8, %v212_v22 }
 0x210   :  { %2268 = vmatprep.mubr.msk.f32.mxu1 %vm232_vm3, %v217_v23 }
 0x211   :  { %v216_v25 = vmax.f32 %v214_v24, 0.0  ;;  %v2114_v24 = vld [vmem:[#allocation2 + $0x51] ss:$0 sm:$0xff] }
 0x213   :  { %v218_v26 = vsel %vm121_vm2, %v166_v6, %v216_v25 }
 0x214   :  { %2269 = vmatmul.mubr.msk.f32.vlgmr.msra.gmra.mrb[0].mxu1 %vm232_vm3, %v218_v26 }
 0x2e7   :  { %v2270_v7 = vpop.f32.mrb[0].mxu1 }
 0x2e8   :  { %v2756_v28 = vadd.f32 %v2270_v7, %v2111_v27  ;;  %v305_v29 = vpop.f32.mrb[1].mxu1 }
 0x2e9   :  { %v2758_v30 = vadd.f32 %v2111_v27, %v305_v29 }
 0x2ea   :  { %364 = vrot.lane.b32.xlu0 %v2756_v28, %s2684_s1  ;;  %v325_v32 = vmul.f32 %v2756_v28, %v2756_v28  ;;  %v319_v34 = vsel %vm121_vm2, %v2756_v28, 0.0 }
 0x2eb   :  { %362 = vrot.lane.b32.xlu1 %v2758_v30, %s2684_s1  ;;  %v324_v31 = vmul.f32 %v2758_v30, %v2758_v30  ;;  %v316_v33 = vsel %vm121_vm2, %v2758_v30, 0.0 }
 0x2ec   :  { %v329_v41 = vsel %vm121_vm2, %v325_v32, 0.0 }
 0x2ed   :  { %v326_v35 = vsel %vm121_vm2, %v324_v31, 0.0 }
 0x2ef   :  { %378 = vrot.lane.b32.xlu1 %v324_v31, %s2684_s1 }
 0x2f3   :  { %380 = vrot.lane.b32.xlu1 %v325_v32, %s2684_s1  ;;  %v2115_v32 = vld [vmem:[#allocation2 + $0x52] ss:$0 sm:$0xff] }
 0x309   :  { %317 = vadd.xlane.f32.xlu0 %v316_v33 }
 0x30d   :  { %320 = vadd.xlane.f32.xlu0 %v319_v34 }
 0x317   :  { %327 = vadd.xlane.f32.xlu1 %v326_v35 }
 0x35c   :  { %v365_v36 = vpop.permute.xlu0 %364 }
 0x35d   :  { %v363_v37 = vpop.permute.xlu1 %362  ;;  %v371_v38 = vsel %vm121_vm2, %v365_v36, 0.0 }
 0x35e   :  { %372 = vadd.xlane.f32.xlu0 %v371_v38  ;;  %v368_v39 = vsel %vm121_vm2, %v363_v37, 0.0 }
 0x35f   :  { %369 = vadd.xlane.f32.xlu1 %v368_v39 }
 0x361   :  { %v379_v40 = vpop.permute.xlu1 %378 }
 0x362   :  { %v384_v42 = vsel %vm121_vm2, %v379_v40, 0.0 }
 0x363   :  { %330 = vadd.xlane.f32.xlu1 %v329_v41  ;;  %385 = vadd.xlane.f32.xlu0 %v384_v42 }
 0x365   :  { %v381_v43 = vpop.permute.xlu1 %380 }
 0x366   :  { %v387_v44 = vsel %vm121_vm2, %v381_v43, 0.0 }
 0x367   :  { %388 = vadd.xlane.f32.xlu0 %v387_v44 }
 0x396   :  { %v318_v57 = vpop.xlane.xlu0 %317 }
 0x397   :  { %v322_v59 = vmul.f32 0.03125, %v318_v57 }
 0x399   :  { %v334_v61 = vmul.f32 %v322_v59, %v322_v59  ;;  %v348_v25 = vsub.f32 %v2758_v30, %v322_v59  ;;  %v698_v59 = vld [vmem:[#allocation2 + $0xe8] sm:$0xff] }
 0x39a   :  { %v321_v62 = vpop.xlane.xlu0 %320 }
 0x39b   :  { %v323_v1 = vmul.f32 0.03125, %v321_v62  ;;  %v2685_v62 = vmov 0.0|0.0  }
 0x39c   :  { %2489 = vmatprep.subr.bf16.mxu0 %v2685_v62 }
 0x39d   :  { %v335_v5 = vmul.f32 %v323_v1, %v323_v1  ;;  %v349_v29 = vsub.f32 %v2756_v28, %v323_v1 }
 0x3a4   :  { %v328_v58 = vpop.xlane.xlu1 %327 }
 0x3a5   :  { %v332_v60 = vmul.f32 0.03125, %v328_v58 }
 0x3a7   :  { %v336_v63 = vsub.f32 %v332_v60, %v334_v61  ;;  %v699_v60 = vld [vmem:[#allocation2 + $0xf0] sm:$0xff] }
 0x3a8   :  { %v2807_v61 = vpack.c.bf16 %v699_v60, %v698_v59  ;;  %v2832_v60 = vld [vmem:[#allocation2 + $0x108] ss:$0 sm:$0xff] }
 0x3a9   :  { %v338_v2 = vadd.f32 1e-05, %v336_v63  ;;  %v700_v63 = vld [vmem:[#allocation2 + $0xf8] sm:$0xff] }
 0x3ab   :  { %2585 = vrsqrt.f32 %v338_v2  ;;  %v2687_v2 = vmov 0.0  }
 0x3b5   :  { %v2586_v23 = vpop.eup %2585 }
 0x3b6   :  { %v346_v6 = vmul.f32 %v2586_v23, %v2114_v24  ;;  %v610_v23 = vld [vmem:[#allocation2 + $0xd0] sm:$0xff] }
 0x3b8   :  { %v350_v27 = vmul.f32 %v348_v25, %v346_v6 }
 0x3ba   :  { %v356_v37 = vadd.f32 %v2115_v32, %v350_v27 }
 0x3bc   :  { %v358_v44 = vmax.f32 %v356_v37, 0.0 }
 0x3eb   :  { %v373_v0 = vpop.xlane.xlu0 %372 }
 0x3ec   :  { %v370_v3 = vpop.xlane.xlu1 %369  ;;  %v375_v10 = vmul.f32 0.03125, %v373_v0  ;;  %v701_v0 = vld [vmem:[#allocation2 + $0x100] sm:$0xff] }
 0x3ed   :  { %v374_v4 = vmul.f32 0.03125, %v370_v3  ;;  %v2812_v1 = vpack.c.bf16 %v701_v0, %v700_v63 }
 0x3ee   :  { %v393_v17 = vmul.f32 %v375_v10, %v375_v10  ;;  %v403_v39 = vsub.f32 %v2756_v28, %v375_v10 }
 0x3ef   :  { %v392_v11 = vmul.f32 %v374_v4, %v374_v4  ;;  %v402_v33 = vsub.f32 %v2758_v30, %v374_v4 }
 0x3f0   :  { %v331_v8 = vpop.xlane.xlu1 %330  ;;  %v386_v9 = vpop.xlane.xlu0 %385 }
 0x3f1   :  { %v333_v12 = vmul.f32 0.03125, %v331_v8  ;;  %v390_v13 = vmul.f32 0.03125, %v386_v9 }
 0x3f3   :  { %v337_v14 = vsub.f32 %v333_v12, %v335_v5  ;;  %v394_v15 = vsub.f32 %v390_v13, %v392_v11 }
 0x3f4   :  { %v389_v16 = vpop.xlane.xlu0 %388 }
 0x3f5   :  { %v339_v18 = vadd.f32 1e-05, %v337_v14  ;;  %v396_v19 = vadd.f32 1e-05, %v394_v15  ;;  %v391_v20 = vmul.f32 0.03125, %v389_v16  ;;  %v604_v14 = vld [vmem:[#allocation2 + $0xa0] sm:$0xff] }
 0x3f6   :  { %v605_v15 = vld [vmem:[#allocation2 + $0xa8] sm:$0xff] }
 0x3f7   :  { %2587 = vrsqrt.f32 %v339_v18  ;;  %v395_v21 = vsub.f32 %v391_v20, %v393_v17  ;;  %v2473_v16 = vpack.c.bf16 %v605_v15, %v604_v14  ;;  %v606_v17 = vld [vmem:[#allocation2 + $0xb0] sm:$0xff]  ;;  %v607_v18 = vld [vmem:[#allocation2 + $0xb8] sm:$0xff]  ;;  %v608_v20 = vld [vmem:[#allocation2 + $0xc0] sm:$0xff] }
 0x3f8   :  { %2589 = vrsqrt.f32 %v396_v19  ;;  %v2477_v19 = vpack.c.bf16 %v607_v18, %v606_v17 }
 0x3f9   :  { %v397_v22 = vadd.f32 1e-05, %v395_v21  ;;  %2474 = vmatprep.subr.bf16.mxu1 %v2473_v16  ;;  %v609_v21 = vld [vmem:[#allocation2 + $0xc8] sm:$0xff] }
 0x3fa   :  { %2476 = vmatpush3.bf16.msra.mxu1 %v2473_v16 }
 0x3fb   :  { %2591 = vrsqrt.f32 %v397_v22  ;;  %2478 = vmatprep.subr.bf16.mxu1 %v2477_v19  ;;  %v2481_v22 = vpack.c.bf16 %v609_v21, %v608_v20 }
 0x3fe   :  { %2480 = vmatpush3.bf16.msra.mxu1 %v2477_v19 }
 0x3ff   :  { %2482 = vmatprep.subr.bf16.mxu1 %v2481_v22 }
 0x401   :  { %v2588_v26 = vpop.eup %2587 }
 0x402   :  { %v2590_v7 = vpop.eup %2589  ;;  %v347_v31 = vmul.f32 %v2588_v26, %v2114_v24  ;;  %2484 = vmatpush3.bf16.msra.mxu1 %v2481_v22 }
 0x403   :  { %v400_v34 = vmul.f32 %v2590_v7, %v2114_v24 }
 0x404   :  { %v351_v35 = vmul.f32 %v349_v29, %v347_v31 }
 0x405   :  { %v2592_v36 = vpop.eup %2591  ;;  %v404_v38 = vmul.f32 %v402_v33, %v400_v34 }
 0x406   :  { %v401_v40 = vmul.f32 %v2592_v36, %v2114_v24  ;;  %v357_v42 = vadd.f32 %v2115_v32, %v351_v35  ;;  %v611_v24 = vld [vmem:[#allocation2 + $0xd8] sm:$0xff] }
 0x407   :  { %v406_v41 = vadd.f32 %v2115_v32, %v404_v38  ;;  %v2485_v6 = vpack.c.bf16 %v611_v24, %v610_v23 }
 0x408   :  { %v405_v43 = vmul.f32 %v403_v39, %v401_v40  ;;  %v359_v48 = vmax.f32 %v357_v42, 0.0 }
 0x409   :  { %v408_v45 = vmax.f32 %v406_v41, 0.0  ;;  %2486 = vmatprep.subr.bf16.mxu1 %v2485_v6 }
 0x40a   :  { %v407_v46 = vadd.f32 %v2115_v32, %v405_v43  ;;  %2488 = vmatpush3.bf16.msra.mxu1 %v2485_v6 }
 0x40b   :  { %v410_v47 = vsel %vm121_vm2, %v358_v44, %v408_v45  ;;  %2501 = vmatprep.subr.bf16.mxu1 %v2685_v62 }
 0x40c   :  { %2287 = vmatprep.mubr.msk.f32.mxu0 %vm232_vm3, %v410_v47  ;;  %v409_v30 = vmax.f32 %v407_v46, 0.0 }
 0x40e   :  { %v411_v49 = vsel %vm121_vm2, %v359_v48, %v409_v30 }
 0x40f   :  { %2288 = vmatmul.mubr.msk.f32.vlgmr.msra.gmra.mrb[2].mxu0 %vm232_vm3, %v411_v49 }
 0x410   :  { %2491 = vmatpush3.bf16.msra.mxu0 %v2807_v61  ;;  %2317 = vmatprep.mubr.msk.f32.mxu0 %vm2686_vm4, %v2687_v2 }
 0x411   :  { %2492 = vmatprep.subr.bf16.mxu0 %v2685_v62 }
 0x414   :  { %2494 = vmatpush3.bf16.msra.mxu0 %v2812_v1 }
 0x415   :  { %2495 = vmatprep.subr.bf16.mxu0 %v2685_v62 }
 0x417   :  { %2318 = vmatmul.mubr.f32.vlgmr.msra.gmra.mrb[4].mxu0 %v2687_v2 }
 0x418   :  { %2497 = vmatpush3.bf16.msra.mxu0 %v2807_v61  ;;  %2328 = vmatprep.mubr.msk.f32.mxu0 %vm2686_vm4, %v2687_v2 }
 0x419   :  { %2498 = vmatprep.subr.bf16.mxu0 %v2685_v62 }
 0x41c   :  { %2500 = vmatpush3.bf16.msra.mxu0 %v2812_v1 }
 0x41d   :  { %2507 = vmatprep.subr.bf16.mxu0 %v2685_v62 }
 0x4e2   :  { %v2289_v51 = vpop.f32.mrb[2].mxu0 }
 0x4e3   :  { %v2788_v28 = vadd.f32 %v2289_v51, %v2116_v50  ;;  %v497_v52 = vpop.f32.mrb[3].mxu0 }
 0x4e4   :  { %v2790_v53 = vadd.f32 %v2116_v50, %v497_v52 }
 0x4e5   :  { %556 = vrot.lane.b32.xlu0 %v2788_v28, %s2684_s1  ;;  %v517_v55 = vmul.f32 %v2788_v28, %v2788_v28  ;;  %v511_v57 = vsel %vm121_vm2, %v2788_v28, 0.0 }
 0x4e6   :  { %554 = vrot.lane.b32.xlu1 %v2790_v53, %s2684_s1  ;;  %v516_v54 = vmul.f32 %v2790_v53, %v2790_v53  ;;  %v508_v56 = vsel %vm121_vm2, %v2790_v53, 0.0 }
 0x4e7   :  { %v521_v10 = vsel %vm121_vm2, %v517_v55, 0.0 }
 0x4e8   :  { %v518_v58 = vsel %vm121_vm2, %v516_v54, 0.0 }
 0x4ea   :  { %570 = vrot.lane.b32.xlu1 %v516_v54, %s2684_s1 }
 0x4ee   :  { %572 = vrot.lane.b32.xlu1 %v517_v55, %s2684_s1  ;;  %v2119_v55 = vld [vmem:[#allocation2 + $0x99] ss:$0 sm:$0xff] }
 0x504   :  { %509 = vadd.xlane.f32.xlu0 %v508_v56 }
 0x508   :  { %512 = vadd.xlane.f32.xlu0 %v511_v57 }
 0x512   :  { %519 = vadd.xlane.f32.xlu1 %v518_v58 }
 0x557   :  { %v557_v3 = vpop.permute.xlu0 %556 }
 0x558   :  { %v555_v4 = vpop.permute.xlu1 %554  ;;  %v563_v5 = vsel %vm121_vm2, %v557_v3, 0.0 }
 0x559   :  { %564 = vadd.xlane.f32.xlu0 %v563_v5  ;;  %v560_v8 = vsel %vm121_vm2, %v555_v4, 0.0  ;;  %v2120_v4 = vld [vmem:[#allocation2 + $0x9a] ss:$0 sm:$0xff] }
 0x55a   :  { %561 = vadd.xlane.f32.xlu1 %v560_v8 }
 0x55c   :  { %v571_v9 = vpop.permute.xlu1 %570 }
 0x55d   :  { %v576_v11 = vsel %vm121_vm2, %v571_v9, 0.0  ;;  %v776_v9 = vpop.f32.mrb[4].mxu0 }
 0x55e   :  { %522 = vadd.xlane.f32.xlu1 %v521_v10  ;;  %577 = vadd.xlane.f32.xlu0 %v576_v11  ;;  %v777_v11 = vadd.f32 %v2832_v60, %v776_v9 }
 0x560   :  { %v573_v12 = vpop.permute.xlu1 %572 }
 0x561   :  { %v579_v13 = vsel %vm121_vm2, %v573_v12, 0.0  ;;  %v2319_v12 = vpop.f32.mrb[5].mxu0 }
 0x562   :  { %580 = vadd.xlane.f32.xlu0 %v579_v13 }
 0x56f   :  { %786 = vrot.lane.b32.xlu1 %v777_v11, %s2688_s0 }
 0x591   :  { %v510_v25 = vpop.xlane.xlu0 %509 }
 0x592   :  { %v514_v27 = vmul.f32 0.03125, %v510_v25 }
 0x594   :  { %v526_v29 = vmul.f32 %v514_v27, %v514_v27  ;;  %v540_v57 = vsub.f32 %v2790_v53, %v514_v27 }
 0x595   :  { %v513_v31 = vpop.xlane.xlu0 %512 }
 0x596   :  { %v515_v34 = vmul.f32 0.03125, %v513_v31 }
 0x598   :  { %v527_v38 = vmul.f32 %v515_v34, %v515_v34  ;;  %v541_v0 = vsub.f32 %v2788_v28, %v515_v34 }
 0x59f   :  { %v520_v26 = vpop.xlane.xlu1 %519 }
 0x5a0   :  { %v524_v7 = vmul.f32 0.03125, %v520_v26 }
 0x5a2   :  { %v528_v32 = vsub.f32 %v524_v7, %v526_v29 }
 0x5a4   :  { %v530_v35 = vadd.f32 1e-05, %v528_v32 }
 0x5a6   :  { %2593 = vrsqrt.f32 %v530_v35 }
 0x5b0   :  { %v2594_v54 = vpop.eup %2593 }
 0x5b1   :  { %v538_v56 = vmul.f32 %v2594_v54, %v2119_v55 }
 0x5b3   :  { %v542_v59 = vmul.f32 %v540_v57, %v538_v56 }
 0x5b5   :  { %v548_v14 = vadd.f32 %v2120_v4, %v542_v59 }
 0x5b7   :  { %v550_v21 = vmax.f32 %v548_v14, 0.0 }
 0x5e6   :  { %v565_v33 = vpop.xlane.xlu0 %564 }
 0x5e7   :  { %v562_v36 = vpop.xlane.xlu1 %561  ;;  %v567_v41 = vmul.f32 0.03125, %v565_v33 }
 0x5e8   :  { %v566_v37 = vmul.f32 0.03125, %v562_v36 }
 0x5e9   :  { %v585_v48 = vmul.f32 %v567_v41, %v567_v41  ;;  %v595_v16 = vsub.f32 %v2788_v28, %v567_v41  ;;  %v2121_v28 = vld [vmem:[#allocation2 + $0xe0] ss:$0 sm:$0xff] }
 0x5ea   :  { %v584_v42 = vmul.f32 %v566_v37, %v566_v37  ;;  %v594_v5 = vsub.f32 %v2790_v53, %v566_v37 }
 0x5eb   :  { %v523_v39 = vpop.xlane.xlu1 %522  ;;  %v578_v40 = vpop.xlane.xlu0 %577 }
 0x5ec   :  { %v525_v43 = vmul.f32 0.03125, %v523_v39  ;;  %v582_v44 = vmul.f32 0.03125, %v578_v40 }
 0x5ee   :  { %v529_v45 = vsub.f32 %v525_v43, %v527_v38  ;;  %v586_v46 = vsub.f32 %v582_v44, %v584_v42 }
 0x5ef   :  { %v581_v47 = vpop.xlane.xlu0 %580  ;;  %v787_v35 = vpop.permute.xlu1 %786 }
 0x5f0   :  { %v531_v30 = vadd.f32 1e-05, %v529_v45  ;;  %v588_v49 = vadd.f32 1e-05, %v586_v46  ;;  %v583_v50 = vmul.f32 0.03125, %v581_v47 }
 0x5f2   :  { %2595 = vrsqrt.f32 %v531_v30  ;;  %v587_v51 = vsub.f32 %v583_v50, %v585_v48 }
 0x5f3   :  { %2597 = vrsqrt.f32 %v588_v49 }
 0x5f4   :  { %v589_v52 = vadd.f32 1e-05, %v587_v51 }
 0x5f6   :  { %2599 = vrsqrt.f32 %v589_v52 }
 0x5fc   :  { %v2596_v58 = vpop.eup %2595 }
 0x5fd   :  { %v2598_v63 = vpop.eup %2597  ;;  %v539_v3 = vmul.f32 %v2596_v58, %v2119_v55 }
 0x5fe   :  { %v592_v8 = vmul.f32 %v2598_v63, %v2119_v55 }
 0x5ff   :  { %v543_v10 = vmul.f32 %v541_v0, %v539_v3 }
 0x600   :  { %v2600_v13 = vpop.eup %2599  ;;  %v596_v15 = vmul.f32 %v594_v5, %v592_v8 }
 0x601   :  { %v593_v17 = vmul.f32 %v2600_v13, %v2119_v55  ;;  %v549_v19 = vadd.f32 %v2120_v4, %v543_v10 }
 0x602   :  { %v598_v18 = vadd.f32 %v2120_v4, %v596_v15 }
 0x603   :  { %v597_v20 = vmul.f32 %v595_v16, %v593_v17  ;;  %v551_v24 = vmax.f32 %v549_v19, 0.0 }
 0x604   :  { %v600_v53 = vmax.f32 %v598_v18, 0.0 }
 0x605   :  { %v599_v22 = vadd.f32 %v2120_v4, %v597_v20 }
 0x606   :  { %v602_v23 = vsel %vm121_vm2, %v550_v21, %v600_v53 }
 0x607   :  { %2306 = vmatprep.mubr.msk.f32.mxu1 %vm232_vm3, %v602_v23  ;;  %v601_v6 = vmax.f32 %v599_v22, 0.0 }
 0x609   :  { %v603_v25 = vsel %vm121_vm2, %v551_v24, %v601_v6 }
 0x60a   :  { %2307 = vmatmul.mubr.msk.f32.vlgmr.msra.gmra.mrb[2].mxu1 %vm232_vm3, %v603_v25 }
 0x60b   :  { %2503 = vmatpush3.bf16.msra.mxu1 %v2807_v61  ;;  %2339 = vmatprep.mubr.msk.f32.mxu1 %vm2686_vm4, %v2687_v2 }
 0x60c   :  { %2504 = vmatprep.subr.bf16.mxu1 %v2685_v62 }
 0x60f   :  { %2506 = vmatpush3.bf16.msra.mxu1 %v2812_v1 }
 0x610   :  { %2513 = vmatprep.subr.bf16.mxu1 %v2685_v62 }
 0x6dd   :  { %v2308_v26 = vpop.f32.mrb[2].mxu1 }
 0x6de   :  { %v2849_v27 = vadd.f32 %v2308_v26, %v2121_v28  ;;  %v689_v7 = vpop.f32.mrb[3].mxu1 }
 0x6df   :  { %v2851_v29 = vadd.f32 %v2121_v28, %v689_v7 }
 0x6e1   :  { %v780_v31 = vadd.f32 %v777_v11, %v2851_v29 }
 0x6e3   :  { %v781_v32 = vmul.f32 0.5, %v780_v31 }
 0x6e5   :  { %2601 = vtanh.f32 %v781_v32 }
 0x6ef   :  { %v2602_v33 = vpop.eup %2601 }
 0x6f0   :  { %v783_v34 = vmul.f32 0.5, %v2602_v33 }
 0x6f2   :  { %v784_v36 = vadd.f32 0.5, %v783_v34 }
 0x6f4   :  { %v789_v37 = vmul.f32 %v787_v35, %v784_v36 }
 0x6f6   :  { %791 = vrot.lane.b32.xlu0 %v789_v37, %s2688_s0 }
 0x768   :  { %v792_v38 = vpop.permute.xlu0 %791 }
 0x769   :  { %v794_v39 = vadd.f32 %v792_v38, %v2851_v29 }
 0x76b   :  { %2603 = vtanh.f32 %v794_v39 }
 0x775   :  { %v2604_v40 = vpop.eup %2603 }
 0x776   :  { %v796_v41 = vsub.f32 0.0, %v2604_v40 }
 0x778   :  { %798 = vrot.lane.b32.xlu1 %v796_v41, %s2684_s1 }
 0x77c   :  { %803 = vrot.lane.b32.xlu1 %v2604_v40, %s2684_s1 }
 0x7ea   :  { %v799_v42 = vpop.permute.xlu1 %798 }
 0x7eb   :  { %v801_v43 = vmul.f32 %v799_v42, %v784_v36 }
 0x7ee   :  { %v804_v44 = vpop.permute.xlu1 %803 }
 0x7ef   :  { %v2858_v45 = vadd.f32 %v804_v44, %v801_v43 }
 0x7f1   :  { %808 = vrot.lane.b32.xlu0 %v2858_v45, %s2684_s1 }
 0x863   :  { %v809_v46 = vpop.permute.xlu0 %808 }
 0x864   :  { %2329 = vmatmul.mubr.msk.f32.vlgmr.msra.gmra.mrb[6].mxu0 %vm121_vm2, %v809_v46 }
 0x865   :  { %2509 = vmatpush3.bf16.msra.mxu0 %v2807_v61  ;;  %2350 = vmatprep.mubr.msk.f32.mxu0 %vm2686_vm4, %v2687_v2 }
 0x866   :  { %2510 = vmatprep.subr.bf16.mxu0 %v2685_v62 }
 0x869   :  { %2512 = vmatpush3.bf16.msra.mxu0 %v2812_v1 }
 0x86a   :  { %2519 = vmatprep.subr.bf16.mxu0 %v2685_v62 }
 0x937   :  { %v878_v47 = vpop.f32.mrb[6].mxu0 }
 0x938   :  { %v879_v48 = vadd.f32 %v2832_v60, %v878_v47  ;;  %v2330_v30 = vpop.f32.mrb[7].mxu0 }
 0x93a   :  { %v883_v49 = vrot.slane %v879_v48, 6 }
 0x93c   :  { %890 = vrot.lane.b32.xlu1 %v883_v49, %s2688_s0  ;;  %v885_v50 = vadd.f32 %v883_v49, %v2851_v29 }
 0x93e   :  { %v886_v51 = vmul.f32 0.5, %v885_v50 }
 0x940   :  { %2605 = vtanh.f32 %v886_v51 }
 0x94a   :  { %v2606_v52 = vpop.eup %2605 }
 0x94b   :  { %v888_v54 = vmul.f32 0.5, %v2606_v52 }
 0x94d   :  { %v889_v55 = vadd.f32 0.5, %v888_v54 }
 0x9ae   :  { %v891_v56 = vpop.permute.xlu1 %890 }
 0x9af   :  { %v893_v57 = vmul.f32 %v891_v56, %v889_v55 }
 0x9b1   :  { %895 = vrot.lane.b32.xlu0 %v893_v57, %s2688_s0 }
 0xa23   :  { %v896_v58 = vpop.permute.xlu0 %895 }
 0xa24   :  { %v898_v59 = vadd.f32 %v896_v58, %v2851_v29 }
 0xa26   :  { %2607 = vtanh.f32 %v898_v59 }
 0xa30   :  { %v2608_v63 = vpop.eup %2607 }
 0xa31   :  { %910 = vrot.lane.b32.xlu0 %v2608_v63, %s2684_s1  ;;  %v901_v0 = vrot.slane %v2608_v63, 2 }
 0xa33   :  { %902 = vrot.lane.b32.xlu1 %v901_v0, %s2684_s1 }
 0xaa3   :  { %v911_v9 = vpop.permute.xlu0 %910 }
 0xaa5   :  { %v903_v3 = vpop.permute.xlu1 %902 }
 0xaa6   :  { %v905_v4 = vsub.f32 %v2858_v45, %v903_v3 }
 0xaa8   :  { %v907_v5 = vrot.slane %v905_v4, 6 }
 0xaaa   :  { %v909_v8 = vmul.f32 %v907_v5, %v889_v55 }
 0xaac   :  { %v2877_v10 = vadd.f32 %v911_v9, %v909_v8 }
 0xaae   :  { %v915_v11 = vrot.slane %v2877_v10, 2 }
 0xab0   :  { %916 = vrot.lane.b32.xlu1 %v915_v11, %s2684_s1 }
 0xb22   :  { %v917_v12 = vpop.permute.xlu1 %916 }
 0xb23   :  { %2340 = vmatmul.mubr.msk.f32.vlgmr.msra.gmra.mrb[4].mxu1 %vm121_vm2, %v917_v12 }
 0xb24   :  { %2515 = vmatpush3.bf16.msra.mxu1 %v2807_v61  ;;  %2361 = vmatprep.mubr.msk.f32.mxu1 %vm2686_vm4, %v2687_v2 }
 0xb25   :  { %2516 = vmatprep.subr.bf16.mxu1 %v2685_v62 }
 0xb28   :  { %2518 = vmatpush3.bf16.msra.mxu1 %v2812_v1 }
 0xb29   :  { %2525 = vmatprep.subr.bf16.mxu1 %v2685_v62 }
 0xbf6   :  { %v986_v13 = vpop.f32.mrb[4].mxu1 }
 0xbf7   :  { %v987_v14 = vadd.f32 %v2832_v60, %v986_v13  ;;  %v2341_v15 = vpop.f32.mrb[5].mxu1 }
 0xbf9   :  { %v991_v16 = vrot.slane %v987_v14, 4 }
 0xbfb   :  { %998 = vrot.lane.b32.xlu0 %v991_v16, %s2688_s0  ;;  %v993_v17 = vadd.f32 %v991_v16, %v2851_v29 }
 0xbfd   :  { %v994_v18 = vmul.f32 0.5, %v993_v17 }
 0xbff   :  { %2609 = vtanh.f32 %v994_v18 }
 0xc09   :  { %v2610_v19 = vpop.eup %2609 }
 0xc0a   :  { %v996_v20 = vmul.f32 0.5, %v2610_v19 }
 0xc0c   :  { %v997_v21 = vadd.f32 0.5, %v996_v20 }
 0xc6d   :  { %v999_v53 = vpop.permute.xlu0 %998 }
 0xc6e   :  { %v1001_v22 = vmul.f32 %v999_v53, %v997_v21 }
 0xc70   :  { %1003 = vrot.lane.b32.xlu1 %v1001_v22, %s2688_s0 }
 0xce2   :  { %v1004_v23 = vpop.permute.xlu1 %1003 }
 0xce3   :  { %v1006_v24 = vadd.f32 %v1004_v23, %v2851_v29 }
 0xce5   :  { %2611 = vtanh.f32 %v1006_v24 }
 0xcef   :  { %v2612_v6 = vpop.eup %2611 }
 0xcf0   :  { %1018 = vrot.lane.b32.xlu1 %v2612_v6, %s2684_s1  ;;  %v1009_v25 = vrot.slane %v2612_v6, 2 }
 0xcf2   :  { %1010 = vrot.lane.b32.xlu0 %v1009_v25, %s2684_s1 }
 0xd62   :  { %v1019_v32 = vpop.permute.xlu1 %1018 }
 0xd64   :  { %v1011_v28 = vpop.permute.xlu0 %1010 }
 0xd65   :  { %v1013_v26 = vsub.f32 %v2877_v10, %v1011_v28 }
 0xd67   :  { %v1015_v7 = vrot.slane %v1013_v26, 6 }
 0xd69   :  { %v1017_v31 = vmul.f32 %v1015_v7, %v997_v21 }
 0xd6b   :  { %v2896_v33 = vadd.f32 %v1019_v32, %v1017_v31 }
 0xd6d   :  { %v1023_v34 = vrot.slane %v2896_v33, 4 }
 0xd6f   :  { %1024 = vrot.lane.b32.xlu0 %v1023_v34, %s2684_s1 }
 0xde1   :  { %v1025_v35 = vpop.permute.xlu0 %1024 }
 0xde2   :  { %2351 = vmatmul.mubr.msk.f32.vlgmr.msra.gmra.mrb[8].mxu0 %vm121_vm2, %v1025_v35 }
 0xde3   :  { %2521 = vmatpush3.bf16.msra.mxu0 %v2807_v61  ;;  %2372 = vmatprep.mubr.msk.f32.mxu0 %vm2686_vm4, %v2687_v2 }
 0xde4   :  { %2522 = vmatprep.subr.bf16.mxu0 %v2685_v62 }
 0xde7   :  { %2524 = vmatpush3.bf16.msra.mxu0 %v2812_v1 }
 0xde8   :  { %2531 = vmatprep.subr.bf16.mxu0 %v2685_v62 }
 0xeb5   :  { %v1094_v36 = vpop.f32.mrb[8].mxu0 }
 0xeb6   :  { %v1095_v37 = vadd.f32 %v2832_v60, %v1094_v36  ;;  %v2352_v38 = vpop.f32.mrb[9].mxu0 }
 0xeb8   :  { %v1099_v39 = vrot.slane %v1095_v37, 2 }
 0xeba   :  { %1106 = vrot.lane.b32.xlu1 %v1099_v39, %s2688_s0  ;;  %v1101_v40 = vadd.f32 %v1099_v39, %v2851_v29 }
 0xebc   :  { %v1102_v41 = vmul.f32 0.5, %v1101_v40 }
 0xebe   :  { %2613 = vtanh.f32 %v1102_v41 }
 0xec8   :  { %v2614_v42 = vpop.eup %2613 }
 0xec9   :  { %v1104_v43 = vmul.f32 0.5, %v2614_v42 }
 0xecb   :  { %v1105_v44 = vadd.f32 0.5, %v1104_v43 }
 0xf2c   :  { %v1107_v46 = vpop.permute.xlu1 %1106 }
 0xf2d   :  { %v1109_v47 = vmul.f32 %v1107_v46, %v1105_v44 }
 0xf2f   :  { %1111 = vrot.lane.b32.xlu0 %v1109_v47, %s2688_s0 }
 0xfa1   :  { %v1112_v48 = vpop.permute.xlu0 %1111 }
 0xfa2   :  { %v1114_v30 = vadd.f32 %v1112_v48, %v2851_v29 }
 0xfa4   :  { %2615 = vtanh.f32 %v1114_v30 }
 0xfae   :  { %v2616_v49 = vpop.eup %2615 }
 0xfaf   :  { %1126 = vrot.lane.b32.xlu0 %v2616_v49, %s2684_s1  ;;  %v1117_v50 = vrot.slane %v2616_v49, 2 }
 0xfb1   :  { %1118 = vrot.lane.b32.xlu1 %v1117_v50, %s2684_s1 }
0x1021   :  { %v1127_v56 = vpop.permute.xlu0 %1126 }
0x1023   :  { %v1119_v51 = vpop.permute.xlu1 %1118 }
0x1024   :  { %v1121_v52 = vsub.f32 %v2896_v33, %v1119_v51 }
0x1026   :  { %v1123_v54 = vrot.slane %v1121_v52, 6 }
0x1028   :  { %v1125_v55 = vmul.f32 %v1123_v54, %v1105_v44 }
0x102a   :  { %v2915_v57 = vadd.f32 %v1127_v56, %v1125_v55 }
0x102c   :  { %v1131_v58 = vrot.slane %v2915_v57, 6 }
0x102e   :  { %1132 = vrot.lane.b32.xlu1 %v1131_v58, %s2684_s1 }
0x10a0   :  { %v1133_v29 = vpop.permute.xlu1 %1132 }
0x10a1   :  { %2362 = vmatmul.mubr.msk.f32.vlgmr.msra.gmra.mrb[6].mxu1 %vm121_vm2, %v1133_v29 }
0x10a2   :  { %2527 = vmatpush3.bf16.msra.mxu1 %v2807_v61  ;;  %2383 = vmatprep.mubr.msk.f32.mxu1 %vm2686_vm4, %v2687_v2 }
0x10a3   :  { %2528 = vmatprep.subr.bf16.mxu1 %v2685_v62 }
0x10a6   :  { %2530 = vmatpush3.bf16.msra.mxu1 %v2812_v1 }
0x1174   :  { %v1202_v59 = vpop.f32.mrb[6].mxu1 }
0x1175   :  { %v1203_v63 = vadd.f32 %v2832_v60, %v1202_v59  ;;  %v2363_v0 = vpop.f32.mrb[7].mxu1 }
0x1177   :  { %1212 = vrot.lane.b32.xlu0 %v1203_v63, %s2688_s0  ;;  %v1206_v3 = vadd.f32 %v1203_v63, %v2849_v27 }
0x1179   :  { %v1207_v4 = vmul.f32 0.5, %v1206_v3 }
0x117b   :  { %2617 = vtanh.f32 %v1207_v4 }
0x1185   :  { %v2618_v5 = vpop.eup %2617 }
0x1186   :  { %v1209_v8 = vmul.f32 0.5, %v2618_v5 }
0x1188   :  { %v1210_v9 = vadd.f32 0.5, %v1209_v8 }
0x11e9   :  { %v1213_v11 = vpop.permute.xlu0 %1212 }
0x11ea   :  { %v1215_v12 = vmul.f32 %v1213_v11, %v1210_v9 }
0x11ec   :  { %1217 = vrot.lane.b32.xlu1 %v1215_v12, %s2688_s0 }
0x125e   :  { %v1218_v13 = vpop.permute.xlu1 %1217 }
0x125f   :  { %v1220_v14 = vadd.f32 %v1218_v13, %v2849_v27 }
0x1261   :  { %2619 = vtanh.f32 %v1220_v14 }
0x126b   :  { %v2620_v15 = vpop.eup %2619 }
0x126c   :  { %1232 = vrot.lane.b32.xlu1 %v2620_v15, %s2684_s1  ;;  %v1223_v16 = vrot.slane %v2620_v15, 2 }
0x126e   :  { %1224 = vrot.lane.b32.xlu0 %v1223_v16, %s2684_s1 }
0x12de   :  { %v1233_v21 = vpop.permute.xlu1 %1232 }
0x12e0   :  { %v1225_v17 = vpop.permute.xlu0 %1224 }
0x12e1   :  { %v1227_v18 = vsub.f32 %v2915_v57, %v1225_v17 }
0x12e3   :  { %v1229_v19 = vrot.slane %v1227_v18, 6 }
0x12e5   :  { %v1231_v20 = vmul.f32 %v1229_v19, %v1210_v9 }
0x12e7   :  { %v2933_v53 = vadd.f32 %v1233_v21, %v1231_v20 }
0x12e9   :  { %1237 = vrot.lane.b32.xlu0 %v2933_v53, %s2684_s1 }
0x135b   :  { %v1238_v22 = vpop.permute.xlu0 %1237 }
0x135c   :  { %2373 = vmatmul.mubr.msk.f32.vlgmr.msra.gmra.mrb[10].mxu0 %vm121_vm2, %v1238_v22 }
0x135d   :  { %2533 = vmatpush3.bf16.msra.mxu0 %v2807_v61  ;;  %2394 = vmatprep.mubr.msk.f32.mxu0 %vm2686_vm4, %v2687_v2 }
0x135e   :  { %2534 = vmatprep.subr.bf16.mxu0 %v2685_v62 }
0x1361   :  { %2536 = vmatpush3.bf16.msra.mxu0 %v2812_v1 }
0x142f   :  { %v1307_v23 = vpop.f32.mrb[10].mxu0 }
0x1430   :  { %v1308_v24 = vadd.f32 %v2832_v60, %v1307_v23  ;;  %v2374_v6 = vpop.f32.mrb[11].mxu0 }
0x1431   :  { %v1568_v6 = vld [vmem:[#allocation2 + $0x118] sm:$0xff] }
0x1432   :  { %v1312_v25 = vrot.slane %v1308_v24, 6 }
0x1434   :  { %1319 = vrot.lane.b32.xlu1 %v1312_v25, %s2688_s0  ;;  %v1314_v28 = vadd.f32 %v1312_v25, %v2849_v27  ;;  %v1569_v25 = vld [vmem:[#allocation2 + $0x120] sm:$0xff] }
0x1436   :  { %v1315_v26 = vmul.f32 0.5, %v1314_v28 }
0x1438   :  { %2621 = vtanh.f32 %v1315_v26 }
0x1442   :  { %v2622_v7 = vpop.eup %2621 }
0x1443   :  { %v1317_v61 = vmul.f32 0.5, %v2622_v7  ;;  %v1570_v7 = vld [vmem:[#allocation2 + $0x128] sm:$0xff] }
0x1445   :  { %v1318_v31 = vadd.f32 0.5, %v1317_v61 }
0x14a6   :  { %v1320_v32 = vpop.permute.xlu1 %1319 }
0x14a7   :  { %v1322_v2 = vmul.f32 %v1320_v32, %v1318_v31 }
0x14a9   :  { %1324 = vrot.lane.b32.xlu0 %v1322_v2, %s2688_s0 }
0x151b   :  { %v1325_v62 = vpop.permute.xlu0 %1324 }
0x151c   :  { %v1327_v1 = vadd.f32 %v1325_v62, %v2849_v27 }
0x151e   :  { %2623 = vtanh.f32 %v1327_v1 }
0x1528   :  { %v2624_v34 = vpop.eup %2623 }
0x1529   :  { %1339 = vrot.lane.b32.xlu0 %v2624_v34, %s2684_s1  ;;  %v1330_v35 = vrot.slane %v2624_v34, 2 }
0x152b   :  { %1331 = vrot.lane.b32.xlu1 %v1330_v35, %s2684_s1 }
0x159b   :  { %v1340_v40 = vpop.permute.xlu0 %1339 }
0x159d   :  { %v1332_v36 = vpop.permute.xlu1 %1331 }
0x159e   :  { %v1334_v37 = vsub.f32 %v2933_v53, %v1332_v36 }
0x15a0   :  { %v1336_v38 = vrot.slane %v1334_v37, 6 }
0x15a2   :  { %v1338_v39 = vmul.f32 %v1336_v38, %v1318_v31  ;;  %v2541_v31 = vpack.c.bf16 %v1570_v7, %v1569_v25 }
0x15a4   :  { %v2951_v41 = vadd.f32 %v1340_v40, %v1338_v39  ;;  %v2132_v39 = vld [vmem:[#allocation2 + $0x170] ss:$0 sm:$0xff] }
0x15a6   :  { %v1344_v42 = vrot.slane %v2951_v41, 2 }
0x15a8   :  { %1345 = vrot.lane.b32.xlu1 %v1344_v42, %s2684_s1 }
0x161a   :  { %v1346_v43 = vpop.permute.xlu1 %1345 }
0x161b   :  { %2384 = vmatmul.mubr.msk.f32.vlgmr.msra.gmra.mrb[8].mxu1 %vm121_vm2, %v1346_v43 }
0x16ee   :  { %v1415_v44 = vpop.f32.mrb[8].mxu1 }
0x16ef   :  { %v1416_v46 = vadd.f32 %v2832_v60, %v1415_v44  ;;  %v2385_v47 = vpop.f32.mrb[9].mxu1 }
0x16f1   :  { %v1420_v48 = vrot.slane %v1416_v46, 4 }
0x16f3   :  { %1427 = vrot.lane.b32.xlu0 %v1420_v48, %s2688_s0  ;;  %v1422_v30 = vadd.f32 %v1420_v48, %v2849_v27 }
0x16f5   :  { %v1423_v49 = vmul.f32 0.5, %v1422_v30 }
0x16f7   :  { %2625 = vtanh.f32 %v1423_v49  ;;  %v1707_v49 = vld [vmem:[#allocation2 + $0x130] sm:$0xff] }
0x1701   :  { %v2626_v50 = vpop.eup %2625 }
0x1702   :  { %v1425_v51 = vmul.f32 0.5, %v2626_v50  ;;  %v1708_v50 = vld [vmem:[#allocation2 + $0x138] sm:$0xff] }
0x1704   :  { %v1426_v52 = vadd.f32 0.5, %v1425_v51  ;;  %v1709_v51 = vld [vmem:[#allocation2 + $0x140] sm:$0xff] }
0x1765   :  { %v1428_v54 = vpop.permute.xlu0 %1427 }
0x1766   :  { %v1430_v55 = vmul.f32 %v1428_v54, %v1426_v52  ;;  %v1710_v54 = vld [vmem:[#allocation2 + $0x148] sm:$0xff] }
0x1768   :  { %1432 = vrot.lane.b32.xlu1 %v1430_v55, %s2688_s0  ;;  %v2549_v55 = vpack.c.bf16 %v1710_v54, %v1709_v51 }
0x17da   :  { %v1433_v56 = vpop.permute.xlu1 %1432 }
0x17db   :  { %v1435_v58 = vadd.f32 %v1433_v56, %v2849_v27 }
0x17dd   :  { %2627 = vtanh.f32 %v1435_v58 }
0x17e7   :  { %v2628_v29 = vpop.eup %2627 }
0x17e8   :  { %1447 = vrot.lane.b32.xlu1 %v2628_v29, %s2684_s1  ;;  %v1438_v59 = vrot.slane %v2628_v29, 2 }
0x17ea   :  { %1439 = vrot.lane.b32.xlu0 %v1438_v59, %s2684_s1 }
0x185a   :  { %v1448_v5 = vpop.permute.xlu1 %1447 }
0x185c   :  { %v1440_v63 = vpop.permute.xlu0 %1439 }
0x185d   :  { %v1442_v0 = vsub.f32 %v2951_v41, %v1440_v63 }
0x185f   :  { %v1444_v3 = vrot.slane %v1442_v0, 6 }
0x1861   :  { %v1446_v4 = vmul.f32 %v1444_v3, %v1426_v52  ;;  %v2545_v52 = vpack.c.bf16 %v1708_v50, %v1707_v49  ;;  %v2140_v50 = vld [vmem:[#allocation2 + $0x174] ss:$0 sm:$0xff] }
0x1863   :  { %v1450_v8 = vadd.f32 %v1448_v5, %v1446_v4  ;;  %2546 = vmatprep.subr.bf16.mxu0 %v2545_v52 }
0x1865   :  { %v1452_v9 = vrot.slane %v1450_v8, 4 }
0x1867   :  { %1453 = vrot.lane.b32.xlu0 %v1452_v9, %s2684_s1 }
0x18d9   :  { %v1454_v11 = vpop.permute.xlu0 %1453 }
0x18da   :  { %2395 = vmatmul.mubr.msk.f32.vlgmr.msra.gmra.mrb[12].mxu0 %vm121_vm2, %v1454_v11 }
0x18db   :  { %2548 = vmatpush3.bf16.msra.mxu0 %v2545_v52 }
0x18dc   :  { %2550 = vmatprep.subr.bf16.mxu0 %v2549_v55 }
0x18df   :  { %2552 = vmatpush3.bf16.msra.mxu0 %v2549_v55 }
0x19ad   :  { %v1523_v12 = vpop.f32.mrb[12].mxu0 }
0x19ae   :  { %v1524_v13 = vadd.f32 %v2832_v60, %v1523_v12  ;;  %v2396_v14 = vpop.f32.mrb[13].mxu0  ;;  %v1567_v60 = vld [vmem:[#allocation2 + $0x110] sm:$0xff] }
0x19af   :  { %v2537_v26 = vpack.c.bf16 %v1568_v6, %v1567_v60  ;;  %v2135_v14 = vld [vmem:[#allocation2 + $0x171] ss:$0 sm:$0xff] }
0x19b0   :  { %v1528_v15 = vrot.slane %v1524_v13, 2 }
0x19b1   :  { %2538 = vmatprep.subr.bf16.mxu1 %v2537_v26 }
0x19b2   :  { %1535 = vrot.lane.b32.xlu1 %v1528_v15, %s2688_s0  ;;  %v1530_v16 = vadd.f32 %v1528_v15, %v2849_v27  ;;  %2540 = vmatpush3.bf16.msra.mxu1 %v2537_v26 }
0x19b3   :  { %2542 = vmatprep.subr.bf16.mxu1 %v2541_v31 }
0x19b4   :  { %v1531_v17 = vmul.f32 0.5, %v1530_v16 }
0x19b6   :  { %2629 = vtanh.f32 %v1531_v17  ;;  %2544 = vmatpush3.bf16.msra.mxu1 %v2541_v31 }
0x19c0   :  { %v2630_v18 = vpop.eup %2629 }
0x19c1   :  { %v1533_v19 = vmul.f32 0.5, %v2630_v18 }
0x19c3   :  { %v1534_v20 = vadd.f32 0.5, %v1533_v19 }
0x1a24   :  { %v1536_v21 = vpop.permute.xlu1 %1535 }
0x1a25   :  { %v1538_v22 = vmul.f32 %v1536_v21, %v1534_v20 }
0x1a27   :  { %1540 = vrot.lane.b32.xlu0 %v1538_v22, %s2688_s0 }
0x1a99   :  { %v1541_v23 = vpop.permute.xlu0 %1540 }
0x1a9a   :  { %v1543_v24 = vadd.f32 %v1541_v23, %v2849_v27  ;;  %v1559_v27 = vsel %vm40_vm0, %v2858_v45, %v2877_v10  ;;  %v1564_v45 = vsel %vm40_vm0, %v2933_v53, %v2951_v41 }
0x1a9b   :  { %v1561_v32 = vsel %vm1560_vm5, %v1559_v27, %v2896_v33  ;;  %v1565_v10 = vsel %vm1560_vm5, %v1564_v45, %v1450_v8  ;;  %v1846_v45 = vld [vmem:[#allocation2 + $0x168] sm:$0xff] }
0x1a9c   :  { %2631 = vtanh.f32 %v1543_v24  ;;  %v1563_v2 = vsel %vm1562_vm6, %v1561_v32, %v2915_v57 }
0x1aa6   :  { %v2632_v28 = vpop.eup %2631 }
0x1aa7   :  { %1555 = vrot.lane.b32.xlu0 %v2632_v28, %s2684_s1  ;;  %v1546_v61 = vrot.slane %v2632_v28, 2  ;;  %v2137_v28 = vld [vmem:[#allocation2 + $0x173] ss:$0 sm:$0xff] }
0x1aa9   :  { %1547 = vrot.lane.b32.xlu1 %v1546_v61, %s2684_s1 }
0x1aad   :  { %1578 = vrot.lane.b32.xlu1 %v1563_v2, %s2684_s1 }
0x1b19   :  { %v1556_v37 = vpop.permute.xlu0 %1555 }
0x1b1b   :  { %v1548_v62 = vpop.permute.xlu1 %1547 }
0x1b1c   :  { %v1550_v1 = vsub.f32 %v1450_v8, %v1548_v62 }
0x1b1e   :  { %v1552_v34 = vrot.slane %v1550_v1, 6 }
0x1b1f   :  { %v1579_v35 = vpop.permute.xlu1 %1578 }
0x1b20   :  { %v1554_v36 = vmul.f32 %v1552_v34, %v1534_v20  ;;  %2405 = vmatprep.mubr.msk.f32.mxu1 %vm121_vm2, %v1579_v35  ;;  %v2136_v20 = vld [vmem:[#allocation2 + $0x172] ss:$0 sm:$0xff] }
0x1b21   :  { %v1843_v35 = vld [vmem:[#allocation2 + $0x150] sm:$0xff] }
0x1b22   :  { %v1558_v38 = vadd.f32 %v1556_v37, %v1554_v36  ;;  %v1844_v36 = vld [vmem:[#allocation2 + $0x158] sm:$0xff]  ;;  %v1845_v37 = vld [vmem:[#allocation2 + $0x160] sm:$0xff] }
0x1b24   :  { %v1566_v33 = vsel %vm1562_vm6, %v1565_v10, %v1558_v38  ;;  %v2553_v38 = vpack.c.bf16 %v1844_v36, %v1843_v35  ;;  %v2557_v10 = vpack.c.bf16 %v1846_v45, %v1845_v37  ;;  %v2145_v36 = vld [vmem:[#allocation2 + $0x177] ss:$0 sm:$0xff] }
0x1b25   :  { %1580 = vrot.lane.b32.xlu0 %v1566_v33, %s2684_s1 }
0x1b26   :  { %2554 = vmatprep.subr.bf16.mxu1 %v2553_v38 }
0x1b97   :  { %v1581_v57 = vpop.permute.xlu0 %1580 }
0x1b98   :  { %2406 = vmatmul.mubr.msk.f32.vlgmr.msra.gmra.mrb[10].mxu1 %vm121_vm2, %v1581_v57 }
0x1b99   :  { %2556 = vmatpush3.bf16.msra.mxu1 %v2553_v38 }
0x1b9a   :  { %2558 = vmatprep.subr.bf16.mxu1 %v2557_v10 }
0x1b9d   :  { %2560 = vmatpush3.bf16.msra.mxu1 %v2557_v10 }
0x1c6b   :  { %v2407_v40 = vpop.f32.mrb[10].mxu1 }
0x1c6c   :  { %v1658_v42 = vadd.f32 %v2407_v40, %v2132_v39  ;;  %v1652_v43 = vpop.f32.mrb[11].mxu1 }
0x1c6d   :  { %v1653_v44 = vadd.f32 %v2132_v39, %v1652_v43 }
0x1c6e   :  { %v1666_v46 = vsel %vm121_vm2, %v1658_v42, 0.0  ;;  %v1672_v41 = vmul.f32 %v1658_v42, %v1658_v42 }
0x1c6f   :  { %1667 = vadd.xlane.f32.xlu0 %v1666_v46  ;;  %v1663_v47 = vsel %vm121_vm2, %v1653_v44, 0.0  ;;  %v1671_v53 = vmul.f32 %v1653_v44, %v1653_v44 }
0x1c70   :  { %1664 = vadd.xlane.f32.xlu1 %v1663_v47  ;;  %v1676_v30 = vsel %vm121_vm2, %v1672_v41, 0.0 }
0x1c71   :  { %v1673_v48 = vsel %vm121_vm2, %v1671_v53, 0.0 }
0x1c73   :  { %1674 = vadd.xlane.f32.xlu0 %v1673_v48 }
0x1c74   :  { %1677 = vadd.xlane.f32.xlu1 %v1676_v30 }
0x1cfc   :  { %v1668_v56 = vpop.xlane.xlu0 %1667 }
0x1cfd   :  { %v1665_v58 = vpop.xlane.xlu1 %1664  ;;  %v1670_v29 = vmul.f32 0.03125, %v1668_v56 }
0x1cfe   :  { %v1669_v59 = vmul.f32 0.03125, %v1665_v58  ;;  %v2141_v58 = vld [vmem:[#allocation2 + $0x175] ss:$0 sm:$0xff] }
0x1cff   :  { %v1682_v5 = vmul.f32 %v1670_v29, %v1670_v29  ;;  %v1696_v19 = vsub.f32 %v1658_v42, %v1670_v29 }
0x1d00   :  { %v1681_v63 = vmul.f32 %v1669_v59, %v1669_v59  ;;  %v1675_v0 = vpop.xlane.xlu0 %1674  ;;  %v1695_v17 = vsub.f32 %v1653_v44, %v1669_v59 }
0x1d01   :  { %v1679_v3 = vmul.f32 0.03125, %v1675_v0  ;;  %v1678_v4 = vpop.xlane.xlu1 %1677 }
0x1d02   :  { %v1680_v8 = vmul.f32 0.03125, %v1678_v4 }
0x1d03   :  { %v1683_v9 = vsub.f32 %v1679_v3, %v1681_v63 }
0x1d04   :  { %v1684_v11 = vsub.f32 %v1680_v8, %v1682_v5  ;;  %v2142_v8 = vld [vmem:[#allocation2 + $0x176] ss:$0 sm:$0xff] }
0x1d05   :  { %v1685_v12 = vadd.f32 1e-05, %v1683_v9 }
0x1d06   :  { %v1686_v13 = vadd.f32 1e-05, %v1684_v11 }
0x1d07   :  { %2633 = vrsqrt.f32 %v1685_v12 }
0x1d08   :  { %2635 = vrsqrt.f32 %v1686_v13 }
0x1d11   :  { %v2634_v15 = vpop.eup %2633 }
0x1d12   :  { %v2636_v16 = vpop.eup %2635  ;;  %v1693_v18 = vmul.f32 %v2634_v15, %v2135_v14 }
0x1d13   :  { %v1694_v21 = vmul.f32 %v2636_v16, %v2135_v14 }
0x1d14   :  { %v1697_v22 = vmul.f32 %v1695_v17, %v1693_v18 }
0x1d15   :  { %v1698_v23 = vmul.f32 %v1696_v19, %v1694_v21  ;;  %v1980_v21 = vld [vmem:[#allocation2 + $0x188] sm:$0xff] }
0x1d16   :  { %v1703_v24 = vadd.f32 %v2136_v20, %v1697_v22  ;;  %v1981_v22 = vld [vmem:[#allocation2 + $0x190] sm:$0xff] }
0x1d17   :  { %v1704_v60 = vadd.f32 %v2136_v20, %v1698_v23  ;;  %v1979_v20 = vld [vmem:[#allocation2 + $0x180] sm:$0xff] }
0x1d18   :  { %v1705_v6 = vmax.f32 %v1703_v24, 0.0  ;;  %v2561_v23 = vpack.c.bf16 %v1980_v21, %v1979_v20  ;;  %v1982_v24 = vld [vmem:[#allocation2 + $0x198] sm:$0xff] }
0x1d19   :  { %v1706_v25 = vmax.f32 %v1704_v60, 0.0  ;;  %v2565_v60 = vpack.c.bf16 %v1982_v24, %v1981_v22 }
0x1d1a   :  { %2416 = vmatprep.mubr.msk.f32.mxu0 %vm121_vm2, %v1705_v6  ;;  %2562 = vmatprep.subr.bf16.mxu0 %v2561_v23 }
0x1d1b   :  { %2417 = vmatmul.mubr.msk.f32.vlgmr.msra.gmra.mrb[14].mxu0 %vm121_vm2, %v1706_v25 }
0x1d1c   :  { %2564 = vmatpush3.bf16.msra.mxu0 %v2561_v23 }
0x1d1d   :  { %2566 = vmatprep.subr.bf16.mxu0 %v2565_v60 }
0x1d20   :  { %2568 = vmatpush3.bf16.msra.mxu0 %v2565_v60 }
0x1dee   :  { %v2418_v26 = vpop.f32.mrb[14].mxu0 }
0x1def   :  { %v1794_v7 = vadd.f32 %v2418_v26, %v2137_v28  ;;  %v1788_v61 = vpop.f32.mrb[15].mxu0 }
0x1df0   :  { %v1789_v31 = vadd.f32 %v2137_v28, %v1788_v61 }
0x1df1   :  { %v1802_v27 = vsel %vm121_vm2, %v1794_v7, 0.0  ;;  %v1808_v32 = vmul.f32 %v1794_v7, %v1794_v7 }
0x1df2   :  { %1803 = vadd.xlane.f32.xlu1 %v1802_v27  ;;  %v1799_v2 = vsel %vm121_vm2, %v1789_v31, 0.0  ;;  %v1807_v62 = vmul.f32 %v1789_v31, %v1789_v31 }
0x1df3   :  { %1800 = vadd.xlane.f32.xlu0 %v1799_v2  ;;  %v1812_v1 = vsel %vm121_vm2, %v1808_v32, 0.0 }
0x1df4   :  { %v1809_v34 = vsel %vm121_vm2, %v1807_v62, 0.0 }
0x1df6   :  { %1813 = vadd.xlane.f32.xlu1 %v1812_v1 }
0x1df7   :  { %1810 = vadd.xlane.f32.xlu0 %v1809_v34 }
0x1e7f   :  { %v1804_v33 = vpop.xlane.xlu1 %1803 }
0x1e80   :  { %v1806_v57 = vmul.f32 0.03125, %v1804_v33  ;;  %v1801_v39 = vpop.xlane.xlu0 %1800 }
0x1e81   :  { %v1805_v40 = vmul.f32 0.03125, %v1801_v39 }
0x1e82   :  { %v1818_v43 = vmul.f32 %v1806_v57, %v1806_v57  ;;  %v1832_v54 = vsub.f32 %v1794_v7, %v1806_v57  ;;  %v2146_v57 = vld [vmem:[#allocation2 + $0x178] ss:$0 sm:$0xff] }
0x1e83   :  { %v1814_v42 = vpop.xlane.xlu1 %1813  ;;  %v1817_v47 = vmul.f32 %v1805_v40, %v1805_v40  ;;  %v1831_v56 = vsub.f32 %v1789_v31, %v1805_v40 }
0x1e84   :  { %v1816_v44 = vmul.f32 0.03125, %v1814_v42  ;;  %v1811_v46 = vpop.xlane.xlu0 %1810 }
0x1e85   :  { %v1815_v53 = vmul.f32 0.03125, %v1811_v46 }
0x1e86   :  { %v1820_v41 = vsub.f32 %v1816_v44, %v1818_v43 }
0x1e87   :  { %v1819_v48 = vsub.f32 %v1815_v53, %v1817_v47  ;;  %v2147_v53 = vld [vmem:[#allocation2 + $0x1a0] ss:$0 sm:$0xff] }
0x1e88   :  { %v1822_v30 = vadd.f32 1e-05, %v1820_v41 }
0x1e89   :  { %v1821_v49 = vadd.f32 1e-05, %v1819_v48 }
0x1e8a   :  { %2637 = vrsqrt.f32 %v1822_v30 }
0x1e8b   :  { %2639 = vrsqrt.f32 %v1821_v49 }
0x1e94   :  { %v2638_v51 = vpop.eup %2637 }
0x1e95   :  { %v2640_v52 = vpop.eup %2639  ;;  %v1830_v55 = vmul.f32 %v2638_v51, %v2140_v50 }
0x1e96   :  { %v1829_v29 = vmul.f32 %v2640_v52, %v2140_v50 }
0x1e97   :  { %v1834_v59 = vmul.f32 %v1832_v54, %v1830_v55 }
0x1e98   :  { %v1833_v63 = vmul.f32 %v1831_v56, %v1829_v29 }
0x1e99   :  { %v1840_v0 = vadd.f32 %v2141_v58, %v1834_v59 }
0x1e9a   :  { %v1839_v3 = vadd.f32 %v2141_v58, %v1833_v63 }
0x1e9b   :  { %v1842_v5 = vmax.f32 %v1840_v0, 0.0 }
0x1e9c   :  { %v1841_v4 = vmax.f32 %v1839_v3, 0.0 }
0x1e9e   :  { %2427 = vmatprep.mubr.msk.f32.mxu1 %vm121_vm2, %v1841_v4 }
0x1e9f   :  { %2428 = vmatmul.mubr.msk.f32.vlgmr.msra.gmra.mrb[12].mxu1 %vm121_vm2, %v1842_v5 }
0x1f72   :  { %v2429_v9 = vpop.f32.mrb[12].mxu1 }
0x1f73   :  { %v1930_v11 = vadd.f32 %v2429_v9, %v2142_v8  ;;  %v1924_v12 = vpop.f32.mrb[13].mxu1 }
0x1f74   :  { %v1925_v13 = vadd.f32 %v2142_v8, %v1924_v12 }
0x1f75   :  { %v1938_v14 = vsel %vm121_vm2, %v1930_v11, 0.0  ;;  %v1944_v15 = vmul.f32 %v1930_v11, %v1930_v11 }
0x1f76   :  { %1939 = vadd.xlane.f32.xlu1 %v1938_v14  ;;  %v1935_v16 = vsel %vm121_vm2, %v1925_v13, 0.0  ;;  %v1943_v17 = vmul.f32 %v1925_v13, %v1925_v13 }
0x1f77   :  { %1936 = vadd.xlane.f32.xlu0 %v1935_v16  ;;  %v1948_v18 = vsel %vm121_vm2, %v1944_v15, 0.0 }
0x1f78   :  { %v1945_v19 = vsel %vm121_vm2, %v1943_v17, 0.0 }
0x1f7a   :  { %1949 = vadd.xlane.f32.xlu1 %v1948_v18 }
0x1f7b   :  { %1946 = vadd.xlane.f32.xlu0 %v1945_v19 }
0x2003   :  { %v1940_v6 = vpop.xlane.xlu1 %1939 }
0x2004   :  { %v1942_v25 = vmul.f32 0.03125, %v1940_v6  ;;  %v1937_v28 = vpop.xlane.xlu0 %1936 }
0x2005   :  { %v1941_v26 = vmul.f32 0.03125, %v1937_v28 }
0x2006   :  { %v1954_v61 = vmul.f32 %v1942_v25, %v1942_v25  ;;  %v1968_v45 = vsub.f32 %v1930_v11, %v1942_v25 }
0x2007   :  { %v1950_v7 = vpop.xlane.xlu1 %1949  ;;  %v1953_v32 = vmul.f32 %v1941_v26, %v1941_v26  ;;  %v1967_v33 = vsub.f32 %v1925_v13, %v1941_v26 }
0x2008   :  { %v1952_v31 = vmul.f32 0.03125, %v1950_v7  ;;  %v1947_v27 = vpop.xlane.xlu0 %1946 }
0x2009   :  { %v1951_v2 = vmul.f32 0.03125, %v1947_v27 }
0x200a   :  { %v1956_v62 = vsub.f32 %v1952_v31, %v1954_v61 }
0x200b   :  { %v1955_v1 = vsub.f32 %v1951_v2, %v1953_v32 }
0x200c   :  { %v1958_v34 = vadd.f32 1e-05, %v1956_v62 }
0x200d   :  { %v1957_v35 = vadd.f32 1e-05, %v1955_v1 }
0x200e   :  { %2641 = vrsqrt.f32 %v1958_v34 }
0x200f   :  { %2643 = vrsqrt.f32 %v1957_v35 }
0x2018   :  { %v2642_v37 = vpop.eup %2641 }
0x2019   :  { %v2644_v38 = vpop.eup %2643  ;;  %v1966_v10 = vmul.f32 %v2642_v37, %v2145_v36 }
0x201a   :  { %v1965_v39 = vmul.f32 %v2644_v38, %v2145_v36 }
0x201b   :  { %v1970_v40 = vmul.f32 %v1968_v45, %v1966_v10 }
0x201c   :  { %v1969_v42 = vmul.f32 %v1967_v33, %v1965_v39 }
0x201d   :  { %v1976_v43 = vadd.f32 %v2146_v57, %v1970_v40 }
0x201e   :  { %v1975_v44 = vadd.f32 %v2146_v57, %v1969_v42 }
0x201f   :  { %v1978_v47 = vmax.f32 %v1976_v43, 0.0 }
0x2020   :  { %v1977_v46 = vmax.f32 %v1975_v44, 0.0 }
0x2022   :  { %2438 = vmatprep.mubr.msk.f32.mxu0 %vm121_vm2, %v1977_v46 }
0x2023   :  { %2439 = vmatmul.mubr.msk.f32.vlgmr.msra.gmra.mrb[16].mxu0 %vm121_vm2, %v1978_v47 }
0x20f6   :  { %v2440_v41 = vpop.f32.mrb[16].mxu0 }
0x20f7   :  { %v2066_v48 = vadd.f32 %v2440_v41, %v2147_v53  ;;  %v2060_v30 = vpop.f32.mrb[17].mxu0 }
0x20f8   :  { %v2061_v49 = vadd.f32 %v2147_v53, %v2060_v30 }
0x20f9   :  { %v2072_v50 = vand.u32 2147483647, %v2066_v48  ;;  %v2070_v4 = vmin.f32 %v2066_v48, 0.0 }
0x20fa   :  { %v2071_v51 = vand.u32 2147483647, %v2061_v49  ;;  %v2069_v8 = vmin.f32 %v2061_v49, 0.0 }
0x20fb   :  { %v2074_v52 = vsub.f32 0.0, %v2072_v50 }
0x20fc   :  { %v2073_v54 = vsub.f32 0.0, %v2071_v51 }
0x20fd   :  { %v2077_v55 = vmul.f32 1.442695, %v2074_v52 }
0x20fe   :  { %v2075_v56 = vmul.f32 1.442695, %v2073_v54 }
0x20ff   :  { %2645 = vpow2.f32 %v2077_v55 }
0x2100   :  { %2647 = vpow2.f32 %v2075_v56 }
0x2109   :  { %v2646_v58 = vpop.eup %2645 }
0x210a   :  { %v2648_v29 = vpop.eup %2647  ;;  %v2080_v59 = vadd.f32 1.0, %v2646_v58 }
0x210b   :  { %v2079_v63 = vadd.f32 1.0, %v2648_v29 }
0x210c   :  { %2649 = vlog2.f32 %v2080_v59 }
0x210d   :  { %2651 = vlog2.f32 %v2079_v63 }
0x2116   :  { %v2650_v0 = vpop.eup %2649 }
0x2117   :  { %v2652_v3 = vpop.eup %2651  ;;  %v2084_v5 = vmul.f32 0.6931472, %v2650_v0 }
0x2118   :  { %v2082_v9 = vmul.f32 0.6931472, %v2652_v3 }
0x2119   :  { %v2086_v11 = vsub.f32 %v2070_v4, %v2084_v5 }
0x211a   :  { %v2085_v12 = vsub.f32 %v2069_v8, %v2082_v9 }
0x211b   :  { %v2088_v13 = vmul.f32 2.3, %v2086_v11 }
0x211c   :  { %v2087_v14 = vmul.f32 2.3, %v2085_v12 }
0x211d   :  { %v2091_v15 = vmul.f32 1.442695, %v2088_v13 }
0x211e   :  { %v2089_v16 = vmul.f32 1.442695, %v2087_v14 }
0x211f   :  { %2653 = vpow2.f32 %v2091_v15 }
0x2120   :  { %2655 = vpow2.f32 %v2089_v16 }
0x2129   :  { %v2654_v17 = vpop.eup %2653 }
0x212a   :  { %v2656_v18 = vpop.eup %2655  ;;  %v2094_v19 = vmul.f32 2.0, %v2654_v17 }
0x212b   :  { %v2093_v20 = vmul.f32 2.0, %v2656_v18 }
0x212c   :  { %v2096_v21 = vadd.f32 1e-07, %v2094_v19 }
0x212d   :  { %v2095_v22 = vadd.f32 1e-07, %v2093_v20 }
0x212e   :  { %2099 = vst.msk [vmem:[%s3015_s2 + $0x8] sm:$0xff] %vm2097_vm7, %v2096_v21 }
0x212f   :  { %2098 = vst.msk [vmem:[%s3015_s2] sm:$0xff] %vm2097_vm7, %v2095_v22 }
0x2130   :  { %2104 = vsyncpa [#allocation3], 1 }

</bundles_post_ra>
